<compile_context>
chip_gen: v7x
topology: tpu7x:2x2x1
jax: 0.10.0
libtpu: 0.0.40
codegen_flags: <defaults>
</compile_context>

<pallas_src>
import functools
import math

import jax
import jax.numpy as jnp
from jax.experimental import pallas as pl
from jax.experimental.pallas import tpu as pltpu


# bias row indices inside the packed 8-row bias block
_B_KVQ1, _B_O1, _B_Q2, _B_KV2, _B_O2, _B_F1, _B_F2 = range(7)


def _gelu_exact(x):
    # F.gelu default ("none") = exact erf GELU.
    return 0.5 * x * (1.0 + jax.lax.erf(x * (1.0 / math.sqrt(2.0))))


# --------------------------- pure-JAX reference --------------------------------
def _layernorm(x, g, b, eps=1e-5):
    mu = jnp.mean(x, axis=-1, keepdims=True)
    var = jnp.mean(jnp.square(x - mu), axis=-1, keepdims=True)
    return (x - mu) * jax.lax.rsqrt(var + eps) * g + b


def _ref_mha(xq, xkv, wq, bq, wk, bk, wv, bv, wo, bo, e, f, mask, *, head):
    S, D = xq.shape
    dk = D // head
    scale = 1.0 / math.sqrt(dk)
    q = xq @ wq + bq
    k = xkv @ wk + bk
    v = xkv @ wv + bv
    outs = []
    for h in range(head):
        lo = h * dk
        qh, kh, vh = q[:, lo:lo + dk], k[:, lo:lo + dk], v[:, lo:lo + dk]
        kp = e @ kh
        vp = f @ vh
        s = qh @ kp.T * scale
        if mask is not None:
            s = jnp.where(mask == 0.0, -1e9, s)
        s = s - jnp.max(s, axis=-1, keepdims=True)
        p = jnp.exp(s)
        p = p / jnp.sum(p, axis=-1, keepdims=True)
        outs.append(p @ vp)
    return jnp.concatenate(outs, axis=-1) @ wo + bo


def _ref_decoder_block(x, enc, mask, params, *, head):
    (g1, be1, wq1, bq1, wk1, bk1, wv1, bv1, wo1, bo1, e1, f1,
     g2, be2, wq2, bq2, wk2, bk2, wv2, bv2, wo2, bo2, e2, f2,
     g3, be3, w1, bf1, w2, bf2) = params
    res = x
    xn = _layernorm(x, g1, be1)
    x = _ref_mha(xn, xn, wq1, bq1, wk1, bk1, wv1, bv1, wo1, bo1,
                 e1, f1, mask, head=head) + res
    res = x  # NOTE: not rebound again -> also feeds the final residual
    xn = _layernorm(x, g2, be2)
    x = _ref_mha(xn, enc, wq2, bq2, wk2, bk2, wv2, bv2, wo2, bo2,
                 e2, f2, None, head=head) + res
    xn = _layernorm(x, g3, be3)
    h = _gelu_exact(xn @ w1 + bf1)
    return h @ w2 + bf2 + res


# ------------------------------- kernel -----------------------------------------
def _decoder_block_kernel(x_ref, enc_ref, slab_ref, ab_ref, out_ref, *,
                          head, layout):
    x = x_ref[...]                       # (B*S, D) flattened activations
    enc = enc_ref[...]                   # (B*S, D)
    BS, D = x.shape
    DFF = layout["w1"][2]
    dk = D // head
    scale = 1.0 / math.sqrt(dk)

    def slab(name):
        o, r, c = layout[name]
        return slab_ref[o:o + r, 0:c]    # lane-0 aligned, 8-row-aligned window

    ln = slab("ln")                      # (6, D): g1, b1, g2, b2, g3, b3
    bias = slab("bias")                  # (8, max(3D, DFF)), one bias per row

    def brow(row, width):
        return bias[row:row + 1, 0:width]

    def ln_apply(v, row):
        g = ln[row:row + 1, :]
        b = ln[row + 1:row + 2, :]
        mu = jnp.mean(v, axis=-1, keepdims=True)
        var = jnp.mean(jnp.square(v - mu), axis=-1, keepdims=True)
        return (v - mu) * jax.lax.rsqrt(var + 1e-5) * g + b

    sel = slab("selmask")                # (2*HBK, 2D) head / K-vs-V selection mask
    bsum = slab("blocksum")              # (HBK, HBK) per-head-block lane-sum matrix
    HBK = bsum.shape[0]
    ab1 = ab_ref[0:BS, :]                # (BS, HBK) additive bias, self-attn
    ab2 = ab_ref[BS:2 * BS, :]           # (BS, HBK) additive bias, cross-attn

    def attn(q, kv, ef, wo_p, bo, abias):
        # Fused Linformer projection of K|V for all heads: row-stacked [E;F]
        # (replicated per head) x lane-concatenated K|V; the selection mask
        # makes the result head-block-diagonal.
        proj = jnp.dot(ef, kv, preferred_element_type=jnp.float32) * sel  # (2HBK, 2D)
        kp = proj[0:HBK, 0:D]            # (HBK, D)  block-diag K projection
        vp = proj[HBK:, :]               # (HBK, 2D) block-diag V projection (cols D:2D)
        # Scores for all heads in one matmul: column block h*B*K:(h+1)*B*K = head h.
        s = jax.lax.dot_general(q, kp, (((1,), (1,)), ((), ())),
                                preferred_element_type=jnp.float32)       # (BS, HBK)
        # Max-subtraction dropped: valid logits are O(1) and masked entries carry
        # -1e9, which underflows exp() to exactly 0.0 in f32.
        p = jnp.exp(s * scale + abias)
        denom = jnp.dot(p, bsum, preferred_element_type=jnp.float32)      # segmented row sums
        p = p * pl.reciprocal(denom, approx=True)
        o_pad = jnp.dot(p, vp, preferred_element_type=jnp.float32)        # (BS, 2D), cols D:2D valid
        # Wo folded with a zero-padded top half -> no lane slice of o_pad needed.
        return jnp.dot(o_pad, wo_p, preferred_element_type=jnp.float32) + bo

    # ---- masked (Linformer) self-attention + residual (fused K|V|Q projection)
    res1 = x
    xn = ln_apply(x, 0)
    kvq = jnp.dot(xn, slab("wkvq1"),
                  preferred_element_type=jnp.float32) + brow(_B_KVQ1, 3 * D)
    x = attn(kvq[:, 2 * D:3 * D], kvq[:, 0:2 * D],
             slab("ef1"), slab("wo1"), brow(_B_O1, D), ab1) + res1

    # ---- cross attention + residual.  NOTE: `res2` also feeds the FINAL
    # residual, matching the PyTorch forward (res is not rebound afterwards).
    res2 = x
    xn = ln_apply(x, 2)
    q2 = jnp.dot(xn, slab("wq2"),
                 preferred_element_type=jnp.float32) + brow(_B_Q2, D)
    kv2 = jnp.dot(enc, slab("wkv2"),
                  preferred_element_type=jnp.float32) + brow(_B_KV2, 2 * D)
    x = attn(q2, kv2, slab("ef2"), slab("wo2"), brow(_B_O2, D), ab2) + res2

    # ---- feed forward (dropout = identity in eval) + residual to res2
    xn = ln_apply(x, 4)
    h = _gelu_exact(jnp.dot(xn, slab("w1"),
                            preferred_element_type=jnp.float32) + brow(_B_F1, DFF))
    out_ref[...] = (jnp.dot(h, slab("w2"), preferred_element_type=jnp.float32)
                    + brow(_B_F2, D) + res2)


# --------------------------- one-time packing ------------------------------------
def prepare_decoder_block(params, mask, *, batch, head):
    """One-time host-side packing (hoisted out of the per-call path):
       slab  : (rows, >=128) f32 — all weights/constants at 8-row-aligned,
               lane-0 static offsets,
       abias : (2*B*S, H*B*K) f32 — additive attention biases (decoder mask +
               cross-batch -1e9 blocks), replicated per head block."""
    (g1, be1, wq1, bq1, wk1, bk1, wv1, bv1, wo1, bo1, e1, f1,
     g2, be2, wq2, bq2, wk2, bk2, wv2, bv2, wo2, bo2, e2, f2,
     g3, be3, w1, bf1, w2, bf2) = params
    K, S = e1.shape
    D = wq1.shape[0]
    DFF = w1.shape[1]
    B, H = batch, head
    dk = D // H
    BS, BK, HBK = B * S, B * K, H * B * K

    ln6 = jnp.concatenate([g1, be1, g2, be2, g3, be3], axis=0)            # (6, D)

    maxw = max(3 * D, 2 * D, DFF)
    pad_row = lambda v: jnp.pad(v, ((0, 0), (0, maxw - v.shape[1])))
    bias8 = jnp.concatenate([
        pad_row(jnp.concatenate([bk1, bv1, bq1], axis=1)),   # row 0: K|V|Q (self)
        pad_row(bo1), pad_row(bq2),
        pad_row(jnp.concatenate([bk2, bv2], axis=1)),
        pad_row(bo2), pad_row(bf1), pad_row(bf2),
        jnp.zeros((1, maxw), jnp.float32)], axis=0)                       # (8, maxw)

    wkvq1 = jnp.concatenate([wk1, wv1, wq1], axis=1)                      # (D, 3D)
    wkv2 = jnp.concatenate([wk2, wv2], axis=1)                            # (D, 2D)
    zD = jnp.zeros((D, D), jnp.float32)
    wo1p = jnp.concatenate([zD, wo1], axis=0)                             # (2D, D)
    wo2p = jnp.concatenate([zD, wo2], axis=0)

    eye_b = jnp.eye(B, dtype=jnp.float32)

    def ef_big(e, f):
        e_blk = jnp.kron(eye_b, e)                                        # (BK, BS)
        f_blk = jnp.kron(eye_b, f)
        return jnp.concatenate([jnp.tile(e_blk, (H, 1)),
                                jnp.tile(f_blk, (H, 1))], axis=0)         # (2*HBK, BS)

    ef1b, ef2b = ef_big(e1, f1), ef_big(e2, f2)

    # head / K-vs-V selection mask for the fused [E;F] @ [K|V] projection output
    rows = jnp.arange(2 * HBK)
    cols = jnp.arange(2 * D)
    is_f = rows >= HBK
    row_head = jnp.where(is_f, rows - HBK, rows) // BK
    col_is_v = cols >= D
    col_head = jnp.where(col_is_v, cols - D, cols) // dk
    sel = ((row_head[:, None] == col_head[None, :]) &
           (is_f[:, None] == col_is_v[None, :])).astype(jnp.float32)      # (2HBK, 2D)

    # per-head-block lane-sum matrix (segmented softmax denominator via MXU)
    hb = jnp.arange(HBK) // BK
    bsum = (hb[:, None] == hb[None, :]).astype(jnp.float32)               # (HBK, HBK)

    items = [("ln", ln6), ("bias", bias8), ("wkvq1", wkvq1), ("wo1", wo1p),
             ("ef1", ef1b), ("wq2", wq2), ("wkv2", wkv2), ("wo2", wo2p),
             ("ef2", ef2b), ("w1", w1), ("w2", w2),
             ("blocksum", bsum), ("selmask", sel)]
    max_c = max(a.shape[1] for _, a in items)
    width = max(128, ((max_c + 127) // 128) * 128)
    layout, padded, off = {}, [], 0
    for name, arr in items:
        r, c = arr.shape
        rp = ((r + 7) // 8) * 8
        layout[name] = (off, r, c)
        padded.append(jnp.pad(arr.astype(jnp.float32),
                              ((0, rp - r), (0, width - c))))
        off += rp
    slab = jnp.concatenate(padded, axis=0)                                # (off, width)

    # additive attention biases: decoder mask folded in + -1e9 on cross-batch
    # blocks, replicated across the H head blocks of the fused key axis.
    in_block = jnp.kron(eye_b, jnp.ones((S, K), jnp.float32))             # (BS, BK)
    mask_bias = jnp.where(mask == 0.0, -1e9, 0.0).astype(jnp.float32)     # (S, K)
    ab1 = jnp.kron(eye_b, mask_bias) + (1.0 - in_block) * (-1e9)
    ab2 = (1.0 - in_block) * (-1e9)
    abias = jnp.concatenate([jnp.tile(ab1, (1, H)),
                             jnp.tile(ab2, (1, H))], axis=0)              # (2BS, HBK)

    return slab, abias, layout, dict(B=B, S=S, D=D, DFF=DFF, K=K, H=H)


# ------------------------------- wrapper ----------------------------------------
def decoder_block_pallas(x, enc, packed):
    slab, abias, layout, dims = packed
    B, S, D = x.shape
    x_flat = x.reshape(B * S, D)
    enc_flat = enc.reshape(B * S, D)
    args = (x_flat, enc_flat, slab, abias)

    def full_spec(shape):
        nd = len(shape)
        return pl.BlockSpec(shape, lambda i, _nd=nd: (0,) * _nd)

    kernel = functools.partial(_decoder_block_kernel,
                               head=dims["H"], layout=layout)
    out_flat = pl.pallas_call(
        kernel,
        out_shape=jax.ShapeDtypeStruct((B * S, D), jnp.float32),
        grid_spec=pltpu.PrefetchScalarGridSpec(
            num_scalar_prefetch=0,
            grid=(1,),                       # whole (tiny) problem in one step
            in_specs=[full_spec(a.shape) for a in args],
            out_specs=full_spec((B * S, D)),
        ),
        compiler_params=pltpu.CompilerParams(
            dimension_semantics=("arbitrary",)),
    )(*args)
    return out_flat.reshape(B, S, D)


# --------------------------- deterministic init ----------------------------------
def _init_params(key, d_model, seq_len, k, d_ff):
    keys = iter(jax.random.split(key, 24))

    def lin(din, dout):
        w = jax.random.normal(next(keys), (din, dout), jnp.float32) * 0.05
        b = jax.random.normal(next(keys), (1, dout), jnp.float32) * 0.05
        return w, b

    def proj():  # Linformer seq->k projection, shared across heads
        return jax.random.normal(next(keys), (k, seq_len), jnp.float32) * 0.05

    def mha():
        wq, bq = lin(d_model, d_model)
        wk, bk = lin(d_model, d_model)
        wv, bv = lin(d_model, d_model)
        wo, bo = lin(d_model, d_model)
        return (wq, bq, wk, bk, wv, bv, wo, bo, proj(), proj())

    ln = lambda: (jnp.ones((1, d_model), jnp.float32),
                  jnp.zeros((1, d_model), jnp.float32))
    g1, b1 = ln()
    mha1 = mha()
    g2, b2 = ln()
    mha2 = mha()
    g3, b3 = ln()
    w1, bf1 = lin(d_model, d_ff)
    w2, bf2 = lin(d_ff, d_model)
    return (g1, b1, *mha1, g2, b2, *mha2, g3, b3, w1, bf1, w2, bf2)


# --------------------------------- main -------------------------------------------
if __name__ == "__main__":
    B, S, D, H, K, DFF = 2, 16, 32, 4, 8, 64  # batch, seq_len, d_model, head, k, d_ff
    root = jax.random.PRNGKey(0)
    kx, kenc, kp_ = jax.random.split(root, 3)
    x = jax.random.normal(kx, (B, S, D), jnp.float32)
    enc = jax.random.normal(kenc, (B, S, D), jnp.float32)
    # TODO(synk): true causal masking over the Linformer-projected k axis is not
    # well-defined; an all-ones mask (no masking) is used here.
    mask = jnp.ones((S, K), jnp.float32)
    params = _init_params(kp_, D, S, K, DFF)

    # one-time parameter / mask packing (hoisted out of the per-call path)
    packed = prepare_decoder_block(params, mask, batch=B, head=H)

    out = decoder_block_pallas(x, enc, packed)
    out = jax.block_until_ready(out)

    # pure-JAX reference (per batch, unfused math) validates all fusions, the
    # head-block-diagonal E/F trick, the segmented softmax and cross-batch masking.
    ref = jnp.stack([_ref_decoder_block(x[b], enc[b], mask, params, head=H)
                     for b in range(B)])
    assert out.shape == (B, S, D)
    err = float(jnp.max(jnp.abs(out - ref)))
    assert bool(jnp.allclose(out, ref, atol=1e-2, rtol=1e-2)), err
    print("KERNEL_OK")
</pallas_src>

<mosaic_0001>
module attributes {stable_mosaic.version = 11 : i64} {
  func.func @_decoder_block_kernel(%arg0: i32, %arg1: memref<32x32xf32, #tpu.memory_space<vmem>>, %arg2: memref<32x32xf32, #tpu.memory_space<vmem>>, %arg3: memref<784x128xf32, #tpu.memory_space<vmem>>, %arg4: memref<64x64xf32, #tpu.memory_space<vmem>>, %arg5: memref<32x32xf32, #tpu.memory_space<vmem>>) attributes {dimension_semantics = [#tpu.dimension_semantics<arbitrary>], iteration_bounds = array<i64: 1>, scalar_prefetch = 0 : i64, scratch_operands = 0 : i64, tpu.core_type = #tpu.core_type<tc>, window_params = [{pipeline_mode = #tpu.pipeline_mode<synchronous>, transform_indices = @transform_0, window_bounds = array<i64: 32, 32>}, {pipeline_mode = #tpu.pipeline_mode<synchronous>, transform_indices = @transform_1, window_bounds = array<i64: 32, 32>}, {pipeline_mode = #tpu.pipeline_mode<synchronous>, transform_indices = @transform_2, window_bounds = array<i64: 784, 128>}, {pipeline_mode = #tpu.pipeline_mode<synchronous>, transform_indices = @transform_3, window_bounds = array<i64: 64, 64>}, {pipeline_mode = #tpu.pipeline_mode<synchronous>, transform_indices = @transform_4, window_bounds = array<i64: 32, 32>}]} {
    %c0 = arith.constant 0 : index
    %c0_0 = arith.constant 0 : index
    %0 = vector.load %arg1[%c0, %c0_0] : memref<32x32xf32, #tpu.memory_space<vmem>>, vector<32x32xf32>
    %c0_1 = arith.constant 0 : index
    %c0_2 = arith.constant 0 : index
    %1 = vector.load %arg2[%c0_1, %c0_2] : memref<32x32xf32, #tpu.memory_space<vmem>>, vector<32x32xf32>
    %c0_3 = arith.constant 0 : index
    %c0_4 = arith.constant 0 : index
    %2 = vector.load %arg3[%c0_3, %c0_4] : memref<784x128xf32, #tpu.memory_space<vmem>>, vector<6x32xf32>
    %c8 = arith.constant 8 : index
    %c0_5 = arith.constant 0 : index
    %3 = vector.load %arg3[%c8, %c0_5] : memref<784x128xf32, #tpu.memory_space<vmem>>, vector<8x96xf32>
    %c656 = arith.constant 656 : index
    %c0_6 = arith.constant 0 : index
    %4 = vector.load %arg3[%c656, %c0_6] : memref<784x128xf32, #tpu.memory_space<vmem>>, vector<128x64xf32>
    %c592 = arith.constant 592 : index
    %c0_7 = arith.constant 0 : index
    %5 = vector.load %arg3[%c592, %c0_7] : memref<784x128xf32, #tpu.memory_space<vmem>>, vector<64x64xf32>
    %c0_8 = arith.constant 0 : index
    %c0_9 = arith.constant 0 : index
    %6 = vector.load %arg4[%c0_8, %c0_9] : memref<64x64xf32, #tpu.memory_space<vmem>>, vector<32x64xf32>
    %c32 = arith.constant 32 : index
    %c0_10 = arith.constant 0 : index
    %7 = vector.load %arg4[%c32, %c0_10] : memref<64x64xf32, #tpu.memory_space<vmem>>, vector<32x64xf32>
    %8 = vector.extract_strided_slice %2 {offsets = [0, 0], sizes = [1, 32], strides = [1, 1]} : vector<6x32xf32> to vector<1x32xf32>
    %9 = vector.extract_strided_slice %2 {offsets = [1, 0], sizes = [1, 32], strides = [1, 1]} : vector<6x32xf32> to vector<1x32xf32>
    %cst = arith.constant dense<0.000000e+00> : vector<32xf32>
    %10 = vector.multi_reduction <add>, %0, %cst [1] : vector<32x32xf32> to vector<32xf32>
    %11 = vector.shape_cast %10 : vector<32xf32> to vector<32x1xf32>
    %cst_11 = arith.constant 3.200000e+01 : f32
    %12 = vector.broadcast %cst_11 : f32 to vector<32x1xf32>
    %13 = arith.divf %11, %12 : vector<32x1xf32>
    %14 = vector.broadcast %13 : vector<32x1xf32> to vector<32x32xf32>
    %15 = arith.subf %0, %14 : vector<32x32xf32>
    %16 = arith.mulf %15, %15 : vector<32x32xf32>
    %cst_12 = arith.constant dense<0.000000e+00> : vector<32xf32>
    %17 = vector.multi_reduction <add>, %16, %cst_12 [1] : vector<32x32xf32> to vector<32xf32>
    %18 = vector.shape_cast %17 : vector<32xf32> to vector<32x1xf32>
    %cst_13 = arith.constant 3.200000e+01 : f32
    %19 = vector.broadcast %cst_13 : f32 to vector<32x1xf32>
    %20 = arith.divf %18, %19 : vector<32x1xf32>
    %21 = vector.broadcast %13 : vector<32x1xf32> to vector<32x32xf32>
    %22 = arith.subf %0, %21 : vector<32x32xf32>
    %cst_14 = arith.constant 9.99999974E-6 : f32
    %23 = vector.broadcast %cst_14 : f32 to vector<32x1xf32>
    %24 = arith.addf %20, %23 : vector<32x1xf32>
    %25 = math.rsqrt %24 : vector<32x1xf32>
    %26 = vector.broadcast %25 : vector<32x1xf32> to vector<32x32xf32>
    %27 = arith.mulf %22, %26 : vector<32x32xf32>
    %28 = vector.broadcast %8 : vector<1x32xf32> to vector<32x32xf32>
    %29 = arith.mulf %27, %28 : vector<32x32xf32>
    %30 = vector.broadcast %9 : vector<1x32xf32> to vector<32x32xf32>
    %31 = arith.addf %29, %30 : vector<32x32xf32>
    %c16 = arith.constant 16 : index
    %c0_15 = arith.constant 0 : index
    %32 = vector.load %arg3[%c16, %c0_15] : memref<784x128xf32, #tpu.memory_space<vmem>>, vector<32x96xf32>
    %cst_16 = arith.constant dense<0.000000e+00> : vector<32x96xf32>
    %33 = tpu.matmul %31, %32, %cst_16 {dimension_numbers = #tpu.dot_dimension_numbers<[1], [0], [0], [1], [0, 0, 1, 1], [], []>} : vector<32x32xf32>, vector<32x96xf32>, vector<32x96xf32> -> vector<32x96xf32>
    %34 = vector.extract_strided_slice %3 {offsets = [0, 0], sizes = [1, 96], strides = [1, 1]} : vector<8x96xf32> to vector<1x96xf32>
    %35 = vector.broadcast %34 : vector<1x96xf32> to vector<32x96xf32>
    %36 = arith.addf %33, %35 : vector<32x96xf32>
    %37 = vector.extract_strided_slice %36 {offsets = [0, 64], sizes = [32, 32], strides = [1, 1]} : vector<32x96xf32> to vector<32x32xf32>
    %38 = vector.extract_strided_slice %36 {offsets = [0, 0], sizes = [32, 64], strides = [1, 1]} : vector<32x96xf32> to vector<32x64xf32>
    %c112 = arith.constant 112 : index
    %c0_17 = arith.constant 0 : index
    %39 = vector.load %arg3[%c112, %c0_17] : memref<784x128xf32, #tpu.memory_space<vmem>>, vector<128x32xf32>
    %c48 = arith.constant 48 : index
    %c0_18 = arith.constant 0 : index
    %40 = vector.load %arg3[%c48, %c0_18] : memref<784x128xf32, #tpu.memory_space<vmem>>, vector<64x32xf32>
    %41 = vector.extract_strided_slice %3 {offsets = [1, 0], sizes = [1, 32], strides = [1, 1]} : vector<8x96xf32> to vector<1x32xf32>
    %cst_19 = arith.constant dense<0.000000e+00> : vector<128x64xf32>
    %42 = tpu.matmul %39, %38, %cst_19 {dimension_numbers = #tpu.dot_dimension_numbers<[1], [0], [0], [1], [0, 0, 1, 1], [], []>} : vector<128x32xf32>, vector<32x64xf32>, vector<128x64xf32> -> vector<128x64xf32>
    %43 = arith.mulf %42, %4 : vector<128x64xf32>
    %44 = vector.extract_strided_slice %43 {offsets = [0, 0], sizes = [64, 32], strides = [1, 1]} : vector<128x64xf32> to vector<64x32xf32>
    %45 = vector.extract_strided_slice %43 {offsets = [64, 0], sizes = [64, 64], strides = [1, 1]} : vector<128x64xf32> to vector<64x64xf32>
    %cst_20 = arith.constant dense<0.000000e+00> : vector<32x64xf32>
    %46 = tpu.matmul %37, %44, %cst_20 {dimension_numbers = #tpu.dot_dimension_numbers<[1], [1], [0], [0], [0, 0, 1, 0], [], []>} : vector<32x32xf32>, vector<64x32xf32>, vector<32x64xf32> -> vector<32x64xf32>
    %cst_21 = arith.constant 0.353553385 : f32
    %47 = vector.broadcast %cst_21 : f32 to vector<32x64xf32>
    %48 = arith.mulf %46, %47 : vector<32x64xf32>
    %49 = arith.addf %48, %6 : vector<32x64xf32>
    %50 = math.exp %49 : vector<32x64xf32>
    %cst_22 = arith.constant dense<0.000000e+00> : vector<32x64xf32>
    %51 = tpu.matmul %50, %5, %cst_22 {dimension_numbers = #tpu.dot_dimension_numbers<[1], [0], [0], [1], [0, 0, 1, 1], [], []>} : vector<32x64xf32>, vector<64x64xf32>, vector<32x64xf32> -> vector<32x64xf32>
    %52 = tpu.reciprocal %51 {approx = true} : vector<32x64xf32> -> vector<32x64xf32>
    %53 = arith.mulf %50, %52 : vector<32x64xf32>
    %cst_23 = arith.constant dense<0.000000e+00> : vector<32x64xf32>
    %54 = tpu.matmul %53, %45, %cst_23 {dimension_numbers = #tpu.dot_dimension_numbers<[1], [0], [0], [1], [0, 0, 1, 1], [], []>} : vector<32x64xf32>, vector<64x64xf32>, vector<32x64xf32> -> vector<32x64xf32>
    %cst_24 = arith.constant dense<0.000000e+00> : vector<32x32xf32>
    %55 = tpu.matmul %54, %40, %cst_24 {dimension_numbers = #tpu.dot_dimension_numbers<[1], [0], [0], [1], [0, 0, 1, 1], [], []>} : vector<32x64xf32>, vector<64x32xf32>, vector<32x32xf32> -> vector<32x32xf32>
    %56 = vector.broadcast %41 : vector<1x32xf32> to vector<32x32xf32>
    %57 = arith.addf %55, %56 : vector<32x32xf32>
    %58 = arith.addf %57, %0 : vector<32x32xf32>
    %59 = vector.extract_strided_slice %2 {offsets = [2, 0], sizes = [1, 32], strides = [1, 1]} : vector<6x32xf32> to vector<1x32xf32>
    %60 = vector.extract_strided_slice %2 {offsets = [3, 0], sizes = [1, 32], strides = [1, 1]} : vector<6x32xf32> to vector<1x32xf32>
    %cst_25 = arith.constant dense<0.000000e+00> : vector<32xf32>
    %61 = vector.multi_reduction <add>, %58, %cst_25 [1] : vector<32x32xf32> to vector<32xf32>
    %62 = vector.shape_cast %61 : vector<32xf32> to vector<32x1xf32>
    %cst_26 = arith.constant 3.200000e+01 : f32
    %63 = vector.broadcast %cst_26 : f32 to vector<32x1xf32>
    %64 = arith.divf %62, %63 : vector<32x1xf32>
    %65 = vector.broadcast %64 : vector<32x1xf32> to vector<32x32xf32>
    %66 = arith.subf %58, %65 : vector<32x32xf32>
    %67 = arith.mulf %66, %66 : vector<32x32xf32>
    %cst_27 = arith.constant dense<0.000000e+00> : vector<32xf32>
    %68 = vector.multi_reduction <add>, %67, %cst_27 [1] : vector<32x32xf32> to vector<32xf32>
    %69 = vector.shape_cast %68 : vector<32xf32> to vector<32x1xf32>
    %cst_28 = arith.constant 3.200000e+01 : f32
    %70 = vector.broadcast %cst_28 : f32 to vector<32x1xf32>
    %71 = arith.divf %69, %70 : vector<32x1xf32>
    %72 = vector.broadcast %64 : vector<32x1xf32> to vector<32x32xf32>
    %73 = arith.subf %58, %72 : vector<32x32xf32>
    %cst_29 = arith.constant 9.99999974E-6 : f32
    %74 = vector.broadcast %cst_29 : f32 to vector<32x1xf32>
    %75 = arith.addf %71, %74 : vector<32x1xf32>
    %76 = math.rsqrt %75 : vector<32x1xf32>
    %77 = vector.broadcast %76 : vector<32x1xf32> to vector<32x32xf32>
    %78 = arith.mulf %73, %77 : vector<32x32xf32>
    %79 = vector.broadcast %59 : vector<1x32xf32> to vector<32x32xf32>
    %80 = arith.mulf %78, %79 : vector<32x32xf32>
    %81 = vector.broadcast %60 : vector<1x32xf32> to vector<32x32xf32>
    %82 = arith.addf %80, %81 : vector<32x32xf32>
    %c240 = arith.constant 240 : index
    %c0_30 = arith.constant 0 : index
    %83 = vector.load %arg3[%c240, %c0_30] : memref<784x128xf32, #tpu.memory_space<vmem>>, vector<32x32xf32>
    %cst_31 = arith.constant dense<0.000000e+00> : vector<32x32xf32>
    %84 = tpu.matmul %82, %83, %cst_31 {dimension_numbers = #tpu.dot_dimension_numbers<[1], [0], [0], [1], [0, 0, 1, 1], [], []>} : vector<32x32xf32>, vector<32x32xf32>, vector<32x32xf32> -> vector<32x32xf32>
    %85 = vector.extract_strided_slice %3 {offsets = [2, 0], sizes = [1, 32], strides = [1, 1]} : vector<8x96xf32> to vector<1x32xf32>
    %86 = vector.broadcast %85 : vector<1x32xf32> to vector<32x32xf32>
    %87 = arith.addf %84, %86 : vector<32x32xf32>
    %c272 = arith.constant 272 : index
    %c0_32 = arith.constant 0 : index
    %88 = vector.load %arg3[%c272, %c0_32] : memref<784x128xf32, #tpu.memory_space<vmem>>, vector<32x64xf32>
    %cst_33 = arith.constant dense<0.000000e+00> : vector<32x64xf32>
    %89 = tpu.matmul %1, %88, %cst_33 {dimension_numbers = #tpu.dot_dimension_numbers<[1], [0], [0], [1], [0, 0, 1, 1], [], []>} : vector<32x32xf32>, vector<32x64xf32>, vector<32x64xf32> -> vector<32x64xf32>
    %90 = vector.extract_strided_slice %3 {offsets = [3, 0], sizes = [1, 64], strides = [1, 1]} : vector<8x96xf32> to vector<1x64xf32>
    %91 = vector.broadcast %90 : vector<1x64xf32> to vector<32x64xf32>
    %92 = arith.addf %89, %91 : vector<32x64xf32>
    %c368 = arith.constant 368 : index
    %c0_34 = arith.constant 0 : index
    %93 = vector.load %arg3[%c368, %c0_34] : memref<784x128xf32, #tpu.memory_space<vmem>>, vector<128x32xf32>
    %c304 = arith.constant 304 : index
    %c0_35 = arith.constant 0 : index
    %94 = vector.load %arg3[%c304, %c0_35] : memref<784x128xf32, #tpu.memory_space<vmem>>, vector<64x32xf32>
    %95 = vector.extract_strided_slice %3 {offsets = [4, 0], sizes = [1, 32], strides = [1, 1]} : vector<8x96xf32> to vector<1x32xf32>
    %cst_36 = arith.constant dense<0.000000e+00> : vector<128x64xf32>
    %96 = tpu.matmul %93, %92, %cst_36 {dimension_numbers = #tpu.dot_dimension_numbers<[1], [0], [0], [1], [0, 0, 1, 1], [], []>} : vector<128x32xf32>, vector<32x64xf32>, vector<128x64xf32> -> vector<128x64xf32>
    %97 = arith.mulf %96, %4 : vector<128x64xf32>
    %98 = vector.extract_strided_slice %97 {offsets = [0, 0], sizes = [64, 32], strides = [1, 1]} : vector<128x64xf32> to vector<64x32xf32>
    %99 = vector.extract_strided_slice %97 {offsets = [64, 0], sizes = [64, 64], strides = [1, 1]} : vector<128x64xf32> to vector<64x64xf32>
    %cst_37 = arith.constant dense<0.000000e+00> : vector<32x64xf32>
    %100 = tpu.matmul %87, %98, %cst_37 {dimension_numbers = #tpu.dot_dimension_numbers<[1], [1], [0], [0], [0, 0, 1, 0], [], []>} : vector<32x32xf32>, vector<64x32xf32>, vector<32x64xf32> -> vector<32x64xf32>
    %cst_38 = arith.constant 0.353553385 : f32
    %101 = vector.broadcast %cst_38 : f32 to vector<32x64xf32>
    %102 = arith.mulf %100, %101 : vector<32x64xf32>
    %103 = arith.addf %102, %7 : vector<32x64xf32>
    %104 = math.exp %103 : vector<32x64xf32>
    %cst_39 = arith.constant dense<0.000000e+00> : vector<32x64xf32>
    %105 = tpu.matmul %104, %5, %cst_39 {dimension_numbers = #tpu.dot_dimension_numbers<[1], [0], [0], [1], [0, 0, 1, 1], [], []>} : vector<32x64xf32>, vector<64x64xf32>, vector<32x64xf32> -> vector<32x64xf32>
    %106 = tpu.reciprocal %105 {approx = true} : vector<32x64xf32> -> vector<32x64xf32>
    %107 = arith.mulf %104, %106 : vector<32x64xf32>
    %cst_40 = arith.constant dense<0.000000e+00> : vector<32x64xf32>
    %108 = tpu.matmul %107, %99, %cst_40 {dimension_numbers = #tpu.dot_dimension_numbers<[1], [0], [0], [1], [0, 0, 1, 1], [], []>} : vector<32x64xf32>, vector<64x64xf32>, vector<32x64xf32> -> vector<32x64xf32>
    %cst_41 = arith.constant dense<0.000000e+00> : vector<32x32xf32>
    %109 = tpu.matmul %108, %94, %cst_41 {dimension_numbers = #tpu.dot_dimension_numbers<[1], [0], [0], [1], [0, 0, 1, 1], [], []>} : vector<32x64xf32>, vector<64x32xf32>, vector<32x32xf32> -> vector<32x32xf32>
    %110 = vector.broadcast %95 : vector<1x32xf32> to vector<32x32xf32>
    %111 = arith.addf %109, %110 : vector<32x32xf32>
    %112 = arith.addf %111, %58 : vector<32x32xf32>
    %113 = vector.extract_strided_slice %2 {offsets = [4, 0], sizes = [1, 32], strides = [1, 1]} : vector<6x32xf32> to vector<1x32xf32>
    %114 = vector.extract_strided_slice %2 {offsets = [5, 0], sizes = [1, 32], strides = [1, 1]} : vector<6x32xf32> to vector<1x32xf32>
    %cst_42 = arith.constant dense<0.000000e+00> : vector<32xf32>
    %115 = vector.multi_reduction <add>, %112, %cst_42 [1] : vector<32x32xf32> to vector<32xf32>
    %116 = vector.shape_cast %115 : vector<32xf32> to vector<32x1xf32>
    %cst_43 = arith.constant 3.200000e+01 : f32
    %117 = vector.broadcast %cst_43 : f32 to vector<32x1xf32>
    %118 = arith.divf %116, %117 : vector<32x1xf32>
    %119 = vector.broadcast %118 : vector<32x1xf32> to vector<32x32xf32>
    %120 = arith.subf %112, %119 : vector<32x32xf32>
    %121 = arith.mulf %120, %120 : vector<32x32xf32>
    %cst_44 = arith.constant dense<0.000000e+00> : vector<32xf32>
    %122 = vector.multi_reduction <add>, %121, %cst_44 [1] : vector<32x32xf32> to vector<32xf32>
    %123 = vector.shape_cast %122 : vector<32xf32> to vector<32x1xf32>
    %cst_45 = arith.constant 3.200000e+01 : f32
    %124 = vector.broadcast %cst_45 : f32 to vector<32x1xf32>
    %125 = arith.divf %123, %124 : vector<32x1xf32>
    %126 = vector.broadcast %118 : vector<32x1xf32> to vector<32x32xf32>
    %127 = arith.subf %112, %126 : vector<32x32xf32>
    %cst_46 = arith.constant 9.99999974E-6 : f32
    %128 = vector.broadcast %cst_46 : f32 to vector<32x1xf32>
    %129 = arith.addf %125, %128 : vector<32x1xf32>
    %130 = math.rsqrt %129 : vector<32x1xf32>
    %131 = vector.broadcast %130 : vector<32x1xf32> to vector<32x32xf32>
    %132 = arith.mulf %127, %131 : vector<32x32xf32>
    %133 = vector.broadcast %113 : vector<1x32xf32> to vector<32x32xf32>
    %134 = arith.mulf %132, %133 : vector<32x32xf32>
    %135 = vector.broadcast %114 : vector<1x32xf32> to vector<32x32xf32>
    %136 = arith.addf %134, %135 : vector<32x32xf32>
    %c496 = arith.constant 496 : index
    %c0_47 = arith.constant 0 : index
    %137 = vector.load %arg3[%c496, %c0_47] : memref<784x128xf32, #tpu.memory_space<vmem>>, vector<32x64xf32>
    %cst_48 = arith.constant dense<0.000000e+00> : vector<32x64xf32>
    %138 = tpu.matmul %136, %137, %cst_48 {dimension_numbers = #tpu.dot_dimension_numbers<[1], [0], [0], [1], [0, 0, 1, 1], [], []>} : vector<32x32xf32>, vector<32x64xf32>, vector<32x64xf32> -> vector<32x64xf32>
    %139 = vector.extract_strided_slice %3 {offsets = [5, 0], sizes = [1, 64], strides = [1, 1]} : vector<8x96xf32> to vector<1x64xf32>
    %140 = vector.broadcast %139 : vector<1x64xf32> to vector<32x64xf32>
    %141 = arith.addf %138, %140 : vector<32x64xf32>
    %cst_49 = arith.constant 5.000000e-01 : f32
    %142 = vector.broadcast %cst_49 : f32 to vector<32x64xf32>
    %143 = arith.mulf %142, %141 : vector<32x64xf32>
    %cst_50 = arith.constant 0.707106769 : f32
    %144 = vector.broadcast %cst_50 : f32 to vector<32x64xf32>
    %145 = arith.mulf %141, %144 : vector<32x64xf32>
    %146 = math.erf %145 : vector<32x64xf32>
    %cst_51 = arith.constant 1.000000e+00 : f32
    %147 = vector.broadcast %cst_51 : f32 to vector<32x64xf32>
    %148 = arith.addf %147, %146 : vector<32x64xf32>
    %149 = arith.mulf %143, %148 : vector<32x64xf32>
    %c528 = arith.constant 528 : index
    %c0_52 = arith.constant 0 : index
    %150 = vector.load %arg3[%c528, %c0_52] : memref<784x128xf32, #tpu.memory_space<vmem>>, vector<64x32xf32>
    %cst_53 = arith.constant dense<0.000000e+00> : vector<32x32xf32>
    %151 = tpu.matmul %149, %150, %cst_53 {dimension_numbers = #tpu.dot_dimension_numbers<[1], [0], [0], [1], [0, 0, 1, 1], [], []>} : vector<32x64xf32>, vector<64x32xf32>, vector<32x32xf32> -> vector<32x32xf32>
    %152 = vector.extract_strided_slice %3 {offsets = [6, 0], sizes = [1, 32], strides = [1, 1]} : vector<8x96xf32> to vector<1x32xf32>
    %153 = vector.broadcast %152 : vector<1x32xf32> to vector<32x32xf32>
    %154 = arith.addf %151, %153 : vector<32x32xf32>
    %155 = arith.addf %154, %58 : vector<32x32xf32>
    %c0_54 = arith.constant 0 : index
    %c0_55 = arith.constant 0 : index
    %156 = vector.load %arg5[%c0_54, %c0_55] : memref<32x32xf32, #tpu.memory_space<vmem>>, vector<32x32xf32>
    tpu.vector_store %arg5[%c0_54, %c0_55], %155 {strides = array<i32>} : memref<32x32xf32, #tpu.memory_space<vmem>>, vector<32x32xf32>,
    return
  }
  func.func @transform_0(%arg0: i32) -> (i32, i32) {
    %c0_i32 = arith.constant 0 : i32
    %c0_i32_0 = arith.constant 0 : i32
    %c0_i32_1 = arith.constant 0 : i32
    return %c0_i32, %c0_i32_0 : i32, i32
  }
  func.func @transform_1(%arg0: i32) -> (i32, i32) {
    %c0_i32 = arith.constant 0 : i32
    %c0_i32_0 = arith.constant 0 : i32
    %c0_i32_1 = arith.constant 0 : i32
    return %c0_i32, %c0_i32_0 : i32, i32
  }
  func.func @transform_2(%arg0: i32) -> (i32, i32) {
    %c0_i32 = arith.constant 0 : i32
    %c0_i32_0 = arith.constant 0 : i32
    %c0_i32_1 = arith.constant 0 : i32
    return %c0_i32, %c0_i32_0 : i32, i32
  }
  func.func @transform_3(%arg0: i32) -> (i32, i32) {
    %c0_i32 = arith.constant 0 : i32
    %c0_i32_0 = arith.constant 0 : i32
    %c0_i32_1 = arith.constant 0 : i32
    return %c0_i32, %c0_i32_0 : i32, i32
  }
  func.func @transform_4(%arg0: i32) -> (i32, i32) {
    %c0_i32 = arith.constant 0 : i32
    %c0_i32_0 = arith.constant 0 : i32
    %c0_i32_1 = arith.constant 0 : i32
    return %c0_i32, %c0_i32_0 : i32, i32
  }
}

</mosaic_0001>

<bundles_post_ra>
// kernel: tpu_custom_call.1
= control target key start
LH: loop header
LB: loop body
LE: loop exit
PB: predicated region body
PF: predicated region fallthrough
CT: control target
= control target key end

     0   :  { %9 = vsyncpa [#allocation3], 0  ;;  %s3748_s0 = inlined_call_operand.hbm [shape: f32[32,32], index: 0, kind: input, shape index: {}]   ;;  %s3749_s1 = inlined_call_operand.hbm [shape: f32[32,32], index: 1, kind: input, shape index: {}]   ;;  %s3750_s2 = inlined_call_operand.hbm [shape: f32[784,128], index: 2, kind: input, shape index: {}]   ;;  %s3751_s3 = inlined_call_operand.hbm [shape: f32[64,64], index: 3, kind: input, shape index: {}]   ;;  %s3752_s4 = inlined_call_operand.hbm [shape: f32[32,32], index: 4, kind: output, shape index: {}]  }
   0x1   :  { %10 = vsyncpa [#allocation6], 0 }
   0x2   :  { %11 = vsyncpa [#allocation9], 0 }
   0x3   :  { %12 = vsyncpa [#allocation4], 0  ;;  %s3258_s15 = smov [#allocation5]   ;;  %s3259_s17 = smov [#allocation2]  }
   0x4   :  { %s30_s16 = sshll.u32 %s3258_s15, 4  ;;  %s18_s18 = sshll.u32 %s3259_s17, 4  ;;  %s31_s16 = int_to_ptr.vmem [resolvable:$true] %s30_s16  ;;  %s3291_s18 = int_to_ptr.vmem [resolvable:$true] %s18_s18 }
   0x5   :  { %s3140_s21 = scalar_lea.hbm %s3749_s1, 512 }
   0x6   :  { %p3141_p0 = scmp.ne.s32.totalorder %s3749_s1, %s3140_s21  ;;  %p3144_p1 = scmp.lt.u32.totalorder %s3140_s21, %s3749_s1 }
   0x8   :  { %p3146_p2 = pnand %p3144_p1, %p3141_p0 }
   0xa   :  { %3149 = shalt.err (!%p3146_p2)
}
   0xb   :  { %s3150_s26 = scalar_lea.vmem %s31_s16, 512  ;;  %p3155_p4 = scmp.lt.s32.totalorder %s31_s16, %s31_s16 }
   0xc   :  { %p3151_p3 = scmp.ne.s32.totalorder %s31_s16, %s3150_s26  ;;  %p3156_p5 = scmp.lt.s32.totalorder %s3150_s26, %s3150_s26 }
   0xe   :  { %p3157_p6 = por %p3156_p5, %p3155_p4 }
  0x10   :  { %p3158_p7 = pnand %p3157_p6, %p3151_p3 }
  0x12   :  { %3161 = shalt.err (!%p3158_p7)
}
  0x13   :  { %s3260_s27 = smov 128   ;;  %s3261_s28 = smov 8  }
  0x14   :  { %36 = dma.hbm_to_vmem [thread:$0]  %s3749_s1, 512, %s31_s16, [#allocation6], %s3260_s27, %s3260_s27, %s3261_s28  }
  0x15   :  { %s3162_s7 = scalar_lea.hbm %s3748_s0, 512 }
  0x16   :  { %p3163_p8 = scmp.ne.s32.totalorder %s3748_s0, %s3162_s7  ;;  %p3166_p9 = scmp.lt.u32.totalorder %s3162_s7, %s3748_s0 }
  0x18   :  { %p3168_p10 = pnand %p3166_p9, %p3163_p8 }
  0x1a   :  { %3171 = shalt.err (!%p3168_p10)
}
  0x1b   :  { %s3172_s12 = scalar_lea.vmem %s3291_s18, 512  ;;  %p3177_p12 = scmp.lt.s32.totalorder %s3291_s18, %s3291_s18 }
  0x1c   :  { %p3173_p11 = scmp.ne.s32.totalorder %s3291_s18, %s3172_s12  ;;  %p3178_p13 = scmp.lt.s32.totalorder %s3172_s12, %s3172_s12 }
  0x1e   :  { %p3179_p0 = por %p3178_p13, %p3177_p12 }
  0x20   :  { %p3180_p1 = pnand %p3179_p0, %p3173_p11 }
  0x22   :  { %3183 = shalt.err (!%p3180_p1)
}
  0x23   :  { %24 = dma.hbm_to_vmem [thread:$0]  %s3748_s0, 512, %s3291_s18, [#allocation3], %s3260_s27, %s3260_s27, %s3261_s28  }
  0x24   :  { %s3262_s14 = smov [#allocation7]   ;;  %s3263_s16 = smov [#allocation8]  }
  0x25   :  { %s42_s15 = sshll.u32 %s3262_s14, 4  ;;  %s54_s17 = sshll.u32 %s3263_s16, 4  ;;  %s43_s15 = int_to_ptr.vmem [resolvable:$true] %s42_s15  ;;  %s3328_s17 = int_to_ptr.vmem [resolvable:$true] %s54_s17 }
  0x26   :  { %s3184_s21 = scalar_lea.hbm %s3750_s2, 12544 }
  0x27   :  { %p3185_p2 = scmp.ne.s32.totalorder %s3750_s2, %s3184_s21  ;;  %p3188_p3 = scmp.lt.u32.totalorder %s3184_s21, %s3750_s2 }
  0x29   :  { %p3190_p4 = pnand %p3188_p3, %p3185_p2 }
  0x2b   :  { %3193 = shalt.err (!%p3190_p4)
}
  0x2c   :  { %s3194_s0 = scalar_lea.vmem %s43_s15, 12544  ;;  %p3199_p6 = scmp.lt.s32.totalorder %s43_s15, %s43_s15 }
  0x2d   :  { %p3195_p5 = scmp.ne.s32.totalorder %s43_s15, %s3194_s0  ;;  %p3200_p7 = scmp.lt.s32.totalorder %s3194_s0, %s3194_s0 }
  0x2f   :  { %p3201_p8 = por %p3200_p7, %p3199_p6 }
  0x31   :  { %p3202_p9 = pnand %p3201_p8, %p3195_p5 }
  0x33   :  { %3205 = shalt.err (!%p3202_p9)
}
  0x34   :  { %48 = dma.hbm_to_vmem [thread:$0]  %s3750_s2, 12544, %s43_s15, [#allocation6], %s3260_s27, %s3260_s27, %s3261_s28  }
  0x35   :  { %s3206_s5 = scalar_lea.hbm %s3751_s3, 1024 }
  0x36   :  { %p3207_p10 = scmp.ne.s32.totalorder %s3751_s3, %s3206_s5  ;;  %p3210_p11 = scmp.lt.u32.totalorder %s3206_s5, %s3751_s3 }
  0x38   :  { %p3212_p12 = pnand %p3210_p11, %p3207_p10 }
  0x3a   :  { %3215 = shalt.err (!%p3212_p12)
}
  0x3b   :  { %s3216_s10 = scalar_lea.vmem %s3328_s17, 1024  ;;  %p3221_p0 = scmp.lt.s32.totalorder %s3328_s17, %s3328_s17 }
  0x3c   :  { %p3217_p13 = scmp.ne.s32.totalorder %s3328_s17, %s3216_s10  ;;  %p3222_p1 = scmp.lt.s32.totalorder %s3216_s10, %s3216_s10 }
  0x3e   :  { %p3223_p2 = por %p3222_p1, %p3221_p0 }
  0x40   :  { %p3224_p3 = pnand %p3223_p2, %p3217_p13 }
  0x42   :  { %3227 = shalt.err (!%p3224_p3)
}
  0x43   :  { %60 = dma.hbm_to_vmem [thread:$0]  %s3751_s3, 1024, %s3328_s17, [#allocation9], %s3260_s27, %s3260_s27, %s3261_s28  }
  0x44   :  { %3250 = dma.done.wait [#allocation3], 512  }
  0x45   :  { %3251 = vsyncadd [#allocation3], 4294966784 }
  0x46   :  { %3252 = dma.done.wait [#allocation6], 13056  }
  0x47   :  { %3253 = vsyncadd [#allocation6], 4294954240 }
  0x48   :  { %3254 = dma.done.wait [#allocation9], 1024  }
  0x49   :  { %3255 = vsyncadd [#allocation9], 4294966272  ;;  %vm115_vm0 = vcmask 261120   ;;  %v3365_v0 = vld [vmem:[#allocation2] sm:$0xff]  ;;  %v3367_v1 = vld [vmem:[#allocation2 + $0x10] sm:$0xff]  ;;  %v169_v36 = vlaneseq  ;;  %s3264_s3 = smov 64  }
  0x4a   :  { %v3369_v2 = vld [vmem:[#allocation2 + $0x8] sm:$0xff]  ;;  %v116_v3 = vsel %vm115_vm0, %v3365_v0, 0.0  ;;  %v122_v4 = vsel %vm115_vm0, %v3367_v1, 0.0  ;;  %v3375_v5 = vld [vmem:[#allocation2 + $0x18] sm:$0xff]  ;;  %v185_v28 = vld [vmem:[#allocation7 + $0x10] sm:$0xff]  ;;  %vm668_vm2 = vcmask 523264  }
  0x4b   :  { %117 = vadd.xlane.f32.xlu0 %v116_v3  ;;  %123 = vadd.xlane.f32.xlu1 %v122_v4  ;;  %v119_v6 = vsel %vm115_vm0, %v3369_v2, 0.0  ;;  %v125_v7 = vsel %vm115_vm0, %v3375_v5, 0.0  ;;  %v186_v29 = vld [vmem:[#allocation7 + $0x18] sm:$0xff]  ;;  %v187_v30 = vld [vmem:[#allocation7 + $0x20] sm:$0xff]  ;;  %v188_v32 = vld [vmem:[#allocation7 + $0x28] sm:$0xff]  ;;  %v3389_v42 = vshrl.u32 %v169_v36, 7 }
  0x4c   :  { %v2858_v31 = vpack.c.bf16 %v186_v29, %v185_v28  ;;  %v2862_v33 = vpack.c.bf16 %v188_v32, %v187_v30  ;;  %v3392_v49 = vld [vmem:[#allocation7] sm:$0x3f]  ;;  %v297_v28 = vld [vmem:[#allocation7 + $0xa8] sm:$0xff]  ;;  %v99_v30 = vld [vmem:[#allocation7 + $0x250] sm:$0xff]  ;;  %s3265_s12 = smov [#allocation10]  }
  0x4d   :  { %v171_v47 = vsub.s32 0, %v3389_v42  ;;  %v179_v50 = vsub.s32 1, %v3389_v42  ;;  %v101_v32 = vld [vmem:[#allocation7 + $0x260] sm:$0xff]  ;;  %v3423_v36 = vld [vmem:[#allocation7 + $0x298] sm:$0xff]  ;;  %vm3433_vm1 = vmpackc.low %vm115_vm0, %vm115_vm0  ;;  %s2246_s1 = sshll.u32 %s3265_s12, 4  ;;  %s2247_s1 = int_to_ptr.vmem [resolvable:$true] %s2246_s1 }
  0x4e   :  { %2859 = vmatprep.subr.bf16.mxu1 %v2858_v31  ;;  %s3228_s13 = scalar_lea.vmem %s2247_s1, 512  ;;  %p3233_p5 = scmp.lt.s32.totalorder %s2247_s1, %s2247_s1 }
  0x4f   :  { %120 = vadd.xlane.f32.xlu0 %v119_v6  ;;  %126 = vadd.xlane.f32.xlu1 %v125_v7  ;;  %v172_v51 = vrot.slane %v3392_v49, %v171_v47  ;;  %v180_v54 = vrot.slane %v3392_v49, %v179_v50  ;;  %p3229_p4 = scmp.ne.s32.totalorder %s2247_s1, %s3228_s13  ;;  %p3234_p6 = scmp.lt.s32.totalorder %s3228_s13, %s3228_s13 }
  0x50   :  { %2861 = vmatpush3.bf16.msra.mxu1 %v2858_v31  ;;  %v100_v31 = vld [vmem:[#allocation7 + $0x258] sm:$0xff] }
  0x51   :  { %2863 = vmatprep.subr.bf16.mxu1 %v2862_v33  ;;  %p3235_p7 = por %p3234_p6, %p3233_p5 }
  0x53   :  { %p3236_p8 = pnand %p3235_p7, %p3229_p4 }
  0x54   :  { %2865 = vmatpush3.bf16.msra.mxu1 %v2862_v33  ;;  %v3415_v33 = vpack.c.bf16 %v100_v31, %v99_v30 }
  0xd8   :  { %v118_v8 = vpop.xlane.xlu0 %117  ;;  %v124_v9 = vpop.xlane.xlu1 %123 }
  0xd9   :  { %v129_v10 = vmul.f32 0.03125, %v118_v8  ;;  %v131_v11 = vmul.f32 0.03125, %v124_v9  ;;  %v290_v9 = vld [vmem:[#allocation7 + $0x70] sm:$0xff] }
  0xdb   :  { %v133_v12 = vsub.f32 %v3365_v0, %v129_v10  ;;  %v135_v13 = vsub.f32 %v3367_v1, %v131_v11  ;;  %v3404_v10 = vld [vmem:[#allocation7 + $0x8] sm:$0xff] }
  0xdc   :  { %v121_v14 = vpop.xlane.xlu0 %120  ;;  %v127_v15 = vpop.xlane.xlu1 %126  ;;  %v192_v11 = vrot.slane %v3404_v10, %v171_v47 }
  0xdd   :  { %v130_v16 = vmul.f32 0.03125, %v121_v14  ;;  %v132_v17 = vmul.f32 0.03125, %v127_v15  ;;  %v137_v18 = vmul.f32 %v133_v12, %v133_v12  ;;  %v139_v19 = vmul.f32 %v135_v13, %v135_v13 }
  0xdf   :  { %v134_v20 = vsub.f32 %v3369_v2, %v130_v16  ;;  %v136_v21 = vsub.f32 %v3375_v5, %v132_v17  ;;  %v141_v22 = vsel %vm115_vm0, %v137_v18, 0.0  ;;  %v147_v23 = vsel %vm115_vm0, %v139_v19, 0.0 }
  0xe0   :  { %142 = vadd.xlane.f32.xlu0 %v141_v22  ;;  %v291_v22 = vld [vmem:[#allocation7 + $0x78] sm:$0xff] }
  0xe1   :  { %v138_v24 = vmul.f32 %v134_v20, %v134_v20  ;;  %v140_v25 = vmul.f32 %v136_v21, %v136_v21 }
  0xe3   :  { %v144_v26 = vsel %vm115_vm0, %v138_v24, 0.0  ;;  %v150_v27 = vsel %vm115_vm0, %v140_v25, 0.0  ;;  %v293_v24 = vld [vmem:[#allocation7 + $0x88] sm:$0xff]  ;;  %v294_v25 = vld [vmem:[#allocation7 + $0x90] sm:$0xff] }
  0xe4   :  { %148 = vadd.xlane.f32.xlu0 %v147_v23  ;;  %145 = vadd.xlane.f32.xlu1 %v144_v26  ;;  %v292_v23 = vld [vmem:[#allocation7 + $0x80] sm:$0xff]  ;;  %v295_v26 = vld [vmem:[#allocation7 + $0x98] sm:$0xff] }
  0xe8   :  { %151 = vadd.xlane.f32.xlu1 %v150_v27  ;;  %v296_v27 = vld [vmem:[#allocation7 + $0xa0] sm:$0xff] }
 0x16d   :  { %v143_v34 = vpop.xlane.xlu0 %142 }
 0x16e   :  { %v153_v35 = vmul.f32 0.03125, %v143_v34  ;;  %v102_v34 = vld [vmem:[#allocation7 + $0x268] sm:$0xff] }
 0x170   :  { %v157_v37 = vadd.f32 1e-05, %v153_v35  ;;  %v3417_v35 = vpack.c.bf16 %v102_v34, %v101_v32 }
 0x171   :  { %v146_v38 = vpop.xlane.xlu1 %145  ;;  %v149_v39 = vpop.xlane.xlu0 %148 }
 0x172   :  { %3074 = vrsqrt.f32 %v157_v37  ;;  %v154_v40 = vmul.f32 0.03125, %v146_v38  ;;  %v155_v41 = vmul.f32 0.03125, %v149_v39  ;;  %v3425_v37 = vld [vmem:[#allocation7 + $0x290] sm:$0xff] }
 0x174   :  { %v158_v43 = vadd.f32 1e-05, %v154_v40  ;;  %v159_v44 = vadd.f32 1e-05, %v155_v41 }
 0x175   :  { %v152_v45 = vpop.xlane.xlu1 %151 }
 0x176   :  { %3076 = vrsqrt.f32 %v158_v43  ;;  %v156_v46 = vmul.f32 0.03125, %v152_v45  ;;  %v3429_v43 = vld [vmem:[#allocation7 + $0x2a8] sm:$0xff]  ;;  %v3437_v45 = vld [vmem:[#allocation7 + $0x2a0] sm:$0xff] }
 0x177   :  { %3078 = vrsqrt.f32 %v159_v44  ;;  %v1265_v44 = vld [vmem:[#allocation7 + $0x1c8] sm:$0xff] }
 0x178   :  { %v160_v48 = vadd.f32 1e-05, %v156_v46 }
 0x17a   :  { %3080 = vrsqrt.f32 %v160_v48 }
 0x17c   :  { %v3075_v52 = vpop.eup %3074 }
 0x17d   :  { %v165_v53 = vmul.f32 %v3075_v52, %v133_v12 }
 0x17f   :  { %v173_v55 = vmul.f32 %v172_v51, %v165_v53  ;;  %v3443_v53 = vld [vmem:[#allocation7 + $0x2b8] sm:$0xff] }
 0x180   :  { %v3077_v56 = vpop.eup %3076 }
 0x181   :  { %v3079_v57 = vpop.eup %3078  ;;  %v181_v58 = vadd.f32 %v180_v54, %v173_v55  ;;  %v166_v59 = vmul.f32 %v3077_v56, %v134_v20 }
 0x182   :  { %v167_v60 = vmul.f32 %v3079_v57, %v135_v13 }
 0x183   :  { %2548 = vmatprep.mubr.msk.f32.mxu1 %vm115_vm0, %v181_v58  ;;  %v174_v61 = vmul.f32 %v172_v51, %v166_v59 }
 0x184   :  { %v3081_v62 = vpop.eup %3080  ;;  %v175_v63 = vmul.f32 %v172_v51, %v167_v60  ;;  %v3453_v60 = vld [vmem:[#allocation7 + $0x2c8] sm:$0xff] }
 0x185   :  { %v182_v3 = vadd.f32 %v180_v54, %v174_v61  ;;  %v168_v4 = vmul.f32 %v3081_v62, %v136_v21  ;;  %v3455_v61 = vld [vmem:[#allocation7 + $0x2c0] sm:$0xff] }
 0x186   :  { %v183_v6 = vadd.f32 %v180_v54, %v175_v63 }
 0x187   :  { %2549 = vmatmul.mubr.msk.f32.vlgmr.msra.gmra.mrb[0].mxu1 %vm115_vm0, %v182_v3  ;;  %v176_v7 = vmul.f32 %v172_v51, %v168_v4 }
 0x188   :  { %2551 = vmatprep.mubr.msk.f32.mxu1 %vm115_vm0, %v183_v6 }
 0x189   :  { %v184_v8 = vadd.f32 %v180_v54, %v176_v7  ;;  %v3447_v54 = vld [vmem:[#allocation7 + $0x2b0] sm:$0xff] }
 0x18b   :  { %2552 = vmatmul.mubr.msk.f32.gmra.mrb[2].mxu1 %vm115_vm0, %v184_v8 }
 0x18c   :  { %2562 = vmatprep.mubr.msk.f32.mxu1 %vm115_vm0, %v290_v9 }
 0x25a   :  { %v2550_v12 = vpop.f32.mrb[0].mxu1 }
 0x25b   :  { %v277_v13 = vadd.f32 %v2550_v12, %v192_v11  ;;  %v271_v14 = vpop.f32.mrb[1].mxu1  ;;  %v298_v12 = vld [vmem:[#allocation7 + $0xb0] sm:$0xff] }
 0x25c   :  { %v272_v15 = vadd.f32 %v271_v14, %v192_v11  ;;  %v300_v14 = vld [vmem:[#allocation7 + $0xc0] sm:$0xff] }
 0x25d   :  { %529 = vrot.lane.b32.xlu1 %v277_v13, %s3264_s3 }
 0x25e   :  { %v2866_v16 = vpack.c.bf16 %v277_v13, %v272_v15  ;;  %527 = vrot.lane.b32.xlu0 %v272_v15, %s3264_s3  ;;  %v2553_v17 = vpop.f32.mrb[2].mxu1  ;;  %v299_v13 = vld [vmem:[#allocation7 + $0xb8] sm:$0xff]  ;;  %v301_v15 = vld [vmem:[#allocation7 + $0xc8] sm:$0xff] }
 0x25f   :  { %v287_v18 = vadd.f32 %v2553_v17, %v192_v11  ;;  %v281_v19 = vpop.f32.mrb[3].mxu1  ;;  %v103_v17 = vld [vmem:[#allocation7 + $0x270] sm:$0xff] }
 0x260   :  { %v282_v20 = vadd.f32 %v281_v19, %v192_v11  ;;  %2867 = vmatprep.subr.bf16.mxu1 %v2866_v16  ;;  %v303_v19 = vld [vmem:[#allocation7 + $0xd8] sm:$0xff] }
 0x261   :  { %2869 = vmatpush3.bf16.msra.mxu1 %v2866_v16  ;;  %v302_v16 = vld [vmem:[#allocation7 + $0xd0] sm:$0xff] }
 0x262   :  { %v2870_v21 = vpack.c.bf16 %v287_v18, %v282_v20  ;;  %531 = vrot.lane.b32.xlu1 %v282_v20, %s3264_s3 }
 0x264   :  { %2871 = vmatprep.subr.bf16.mxu1 %v2870_v21 }
 0x265   :  { %2873 = vmatpush3.bf16.msra.mxu1 %v2870_v21  ;;  %v105_v21 = vld [vmem:[#allocation7 + $0x280] sm:$0xff] }
 0x266   :  { %533 = vrot.lane.b32.xlu1 %v287_v18, %s3264_s3  ;;  %2899 = vmatprep.subr.bf16.mxu1 %v3415_v33  ;;  %v104_v18 = vld [vmem:[#allocation7 + $0x278] sm:$0xff] }
 0x267   :  { %v3477_v20 = vpack.c.bf16 %v104_v18, %v103_v17  ;;  %v3516_v18 = vld [vmem:[#allocation7 + $0x2f8] sm:$0xff] }
 0x268   :  { %2563 = vmatmul.mubr.msk.f32.vlgmr.msra.gmra.mrb[4].mxu1 %vm115_vm0, %v291_v22  ;;  %v106_v22 = vld [vmem:[#allocation7 + $0x288] sm:$0xff] }
 0x269   :  { %2565 = vmatprep.mubr.msk.f32.mxu1 %vm115_vm0, %v292_v23  ;;  %2901 = vmatpush3.bf16.msra.mxu1 %v3415_v33  ;;  %v304_v23 = vld [vmem:[#allocation7 + $0xe0] sm:$0xff] }
 0x26a   :  { %2903 = vmatprep.subr.bf16.mxu1 %v3417_v35 }
 0x26c   :  { %2566 = vmatmul.mubr.msk.f32.gmra.mrb[6].mxu1 %vm115_vm0, %v293_v24  ;;  %v3481_v24 = vpack.c.bf16 %v106_v22, %v105_v21 }
 0x26d   :  { %2568 = vmatprep.mubr.msk.f32.mxu1 %vm115_vm0, %v294_v25  ;;  %2905 = vmatpush3.bf16.msra.mxu1 %v3417_v35  ;;  %v305_v25 = vld [vmem:[#allocation7 + $0xe8] sm:$0xff] }
 0x26e   :  { %2907 = vmatprep.subr.bf16.mxu1 %v3477_v20 }
 0x270   :  { %2569 = vmatmul.mubr.msk.f32.gmra.mrb[8].mxu1 %vm115_vm0, %v295_v26  ;;  %v108_v26 = vld [vmem:[#allocation8 + $0x8] sm:$0xff] }
 0x271   :  { %2571 = vmatprep.mubr.msk.f32.mxu1 %vm115_vm0, %v296_v27  ;;  %2909 = vmatpush3.bf16.msra.mxu1 %v3477_v20 }
 0x272   :  { %2911 = vmatprep.subr.bf16.mxu1 %v3481_v24 }
 0x274   :  { %2572 = vmatmul.mubr.msk.f32.gmra.mrb[10].mxu1 %vm115_vm0, %v297_v28 }
 0x275   :  { %2574 = vmatprep.mubr.msk.f32.mxu1 %vm115_vm0, %v298_v12  ;;  %2913 = vmatpush3.bf16.msra.mxu1 %v3481_v24  ;;  %v3512_v12 = vld [vmem:[#allocation7 + $0x2e0] sm:$0xff] }
 0x278   :  { %2575 = vmatmul.mubr.msk.f32.gmra.mrb[12].mxu1 %vm115_vm0, %v299_v13 }
 0x279   :  { %2577 = vmatprep.mubr.msk.f32.mxu1 %vm115_vm0, %v300_v14 }
 0x27c   :  { %2578 = vmatmul.mubr.msk.f32.gmra.mrb[14].mxu1 %vm115_vm0, %v301_v15 }
 0x27d   :  { %2580 = vmatprep.mubr.msk.f32.mxu1 %vm115_vm0, %v302_v16 }
 0x280   :  { %2581 = vmatmul.mubr.msk.f32.gmra.mrb[16].mxu1 %vm115_vm0, %v303_v19  ;;  %v3518_v19 = vld [vmem:[#allocation7 + $0x2f0] sm:$0xff] }
 0x281   :  { %2583 = vmatprep.mubr.msk.f32.mxu1 %vm115_vm0, %v304_v23 }
 0x284   :  { %2584 = vmatmul.mubr.msk.f32.gmra.mrb[18].mxu1 %vm115_vm0, %v305_v25 }
 0x2cf   :  { %v530_v8 = vpop.permute.xlu1 %529 }
 0x2d0   :  { %v528_v29 = vpop.permute.xlu0 %527 }
 0x2d1   :  { %2602 = vmatprep.mubr.msk.f32.mxu0 %vm115_vm0, %v528_v29  ;;  %v107_v29 = vld [vmem:[#allocation8] sm:$0xff] }
 0x2d4   :  { %v532_v9 = vpop.permute.xlu1 %531 }
 0x2d8   :  { %v534_v11 = vpop.permute.xlu1 %533 }
 0x33b   :  { %v2564_v38 = vpop.f32.mrb[4].mxu1 }
 0x33c   :  { %v508_v39 = vmul.f32 %v2564_v38, %v3423_v36  ;;  %v428_v40 = vpop.f32.mrb[5].mxu1  ;;  %v110_v38 = vld [vmem:[#allocation8 + $0x18] sm:$0xff] }
 0x33d   :  { %v507_v41 = vmul.f32 %v428_v40, %v3425_v37 }
 0x33f   :  { %v2874_v46 = vpack.c.bf16 %v508_v39, %v507_v41  ;;  %v2567_v47 = vpop.f32.mrb[6].mxu1 }
 0x340   :  { %v510_v48 = vmul.f32 %v2567_v47, %v3429_v43  ;;  %v438_v51 = vpop.f32.mrb[7].mxu1 }
 0x341   :  { %2876 = vmatprep.subr.msk.bf16.mxu0 %vm3433_vm1, %v2874_v46  ;;  %v509_v52 = vmul.f32 %v438_v51, %v3437_v45 }
 0x342   :  { %2879 = vmatpush3.bf16.xpose.msk.msra.mxu0 %vm3433_vm1, %v2874_v46  ;;  %v109_v46 = vld [vmem:[#allocation8 + $0x10] sm:$0xff] }
 0x343   :  { %v2880_v55 = vpack.c.bf16 %v510_v48, %v509_v52  ;;  %v2570_v56 = vpop.f32.mrb[8].mxu1 }
 0x344   :  { %v512_v57 = vmul.f32 %v2570_v56, %v3443_v53  ;;  %v448_v58 = vpop.f32.mrb[9].mxu1 }
 0x345   :  { %2882 = vmatprep.subr.msk.bf16.mxu0 %vm3433_vm1, %v2880_v55  ;;  %v511_v59 = vmul.f32 %v448_v58, %v3447_v54 }
 0x347   :  { %v2886_v62 = vpack.c.bf16 %v512_v57, %v511_v59  ;;  %v2573_v63 = vpop.f32.mrb[10].mxu1 }
 0x348   :  { %v514_v3 = vmul.f32 %v2573_v63, %v3453_v60  ;;  %v458_v4 = vpop.f32.mrb[11].mxu1 }
 0x349   :  { %v513_v6 = vmul.f32 %v458_v4, %v3455_v61  ;;  %v3506_v4 = vld [vmem:[#allocation7 + $0x2d0] sm:$0xff] }
 0x34a   :  { %2885 = vmatpush3.bf16.xpose.msk.msra.mxu0 %vm3433_vm1, %v2880_v55 }
 0x34b   :  { %2888 = vmatprep.subr.msk.bf16.mxu0 %vm3433_vm1, %v2886_v62  ;;  %v2892_v7 = vpack.c.bf16 %v514_v3, %v513_v6  ;;  %v3504_v3 = vld [vmem:[#allocation7 + $0x2d8] sm:$0xff]  ;;  %v2576_v6 = vpop.f32.mrb[12].mxu1 }
 0x352   :  { %2891 = vmatpush3.bf16.xpose.msk.msra.mxu0 %vm3433_vm1, %v2886_v62 }
 0x353   :  { %2894 = vmatprep.subr.msk.bf16.mxu0 %vm3433_vm1, %v2892_v7 }
 0x35a   :  { %2897 = vmatpush3.bf16.xpose.msk.msra.mxu0 %vm3433_vm1, %v2892_v7  ;;  %v516_v7 = vmul.f32 %v2576_v6, %v3504_v3 }
 0x361   :  { %2603 = vmatmul.mubr.msk.f32.vlgmr.msra.gmra.mrb[0].mxu0 %vm115_vm0, %v530_v8  ;;  %v468_v8 = vpop.f32.mrb[13].mxu1 }
 0x362   :  { %2605 = vmatprep.mubr.msk.f32.mxu0 %vm115_vm0, %v532_v9  ;;  %v515_v9 = vmul.f32 %v468_v8, %v3506_v4  ;;  %v2579_v14 = vpop.f32.mrb[14].mxu1 }
 0x363   :  { %v478_v16 = vpop.f32.mrb[15].mxu1 }
 0x364   :  { %v2914_v13 = vpack.c.bf16 %v516_v7, %v515_v9  ;;  %v517_v17 = vmul.f32 %v478_v16, %v3512_v12  ;;  %v2582_v22 = vpop.f32.mrb[16].mxu1 }
 0x365   :  { %2606 = vmatmul.mubr.msk.f32.gmra.mrb[2].mxu0 %vm115_vm0, %v534_v11  ;;  %v3510_v11 = vld [vmem:[#allocation7 + $0x2e8] sm:$0xff]  ;;  %v520_v23 = vmul.f32 %v2582_v22, %v3516_v18  ;;  %v488_v25 = vpop.f32.mrb[17].mxu1 }
 0x366   :  { %v518_v15 = vmul.f32 %v2579_v14, %v3510_v11  ;;  %2915 = vmatprep.subr.bf16.mxu0 %v2914_v13 }
 0x367   :  { %2917 = vmatpush3.bf16.msra.mxu0 %v2914_v13 }
 0x368   :  { %v2918_v21 = vpack.c.bf16 %v518_v15, %v517_v17 }
 0x36a   :  { %2919 = vmatprep.subr.bf16.mxu0 %v2918_v21 }
 0x36b   :  { %2921 = vmatpush3.bf16.msra.mxu0 %v2918_v21 }
 0x434   :  { %v2604_v27 = vpop.f32.mrb[0].mxu0 }
 0x435   :  { %v653_v28 = vmul.f32 0.35355338, %v2604_v27  ;;  %v633_v30 = vpop.f32.mrb[1].mxu0  ;;  %v3522_v27 = vld [vmem:[#allocation7 + $0x308] sm:$0xff] }
 0x436   :  { %v652_v31 = vmul.f32 0.35355338, %v633_v30  ;;  %v2585_v30 = vpop.f32.mrb[18].mxu1 }
 0x437   :  { %v657_v32 = vadd.f32 %v653_v28, %v108_v26  ;;  %v519_v26 = vmul.f32 %v488_v25, %v3518_v19  ;;  %v3524_v28 = vld [vmem:[#allocation7 + $0x300] sm:$0xff] }
 0x438   :  { %v656_v34 = vadd.f32 %v652_v31, %v107_v29  ;;  %v2607_v39 = vpop.f32.mrb[2].mxu0  ;;  %v522_v31 = vmul.f32 %v2585_v30, %v3522_v27  ;;  %v1149_v30 = vld [vmem:[#allocation7 + $0x110] sm:$0xff] }
 0x439   :  { %v662_v40 = vmul.f32 1.442695, %v657_v32  ;;  %v655_v41 = vmul.f32 0.35355338, %v2607_v39  ;;  %v643_v47 = vpop.f32.mrb[3].mxu0  ;;  %v2922_v29 = vpack.c.bf16 %v520_v23, %v519_v26  ;;  %v498_v32 = vpop.f32.mrb[19].mxu1 }
 0x43a   :  { %v660_v48 = vmul.f32 1.442695, %v656_v34  ;;  %v654_v51 = vmul.f32 0.35355338, %v643_v47  ;;  %v521_v34 = vmul.f32 %v498_v32, %v3524_v28  ;;  %v306_v39 = vld [vmem:[#allocation7 + $0x30] sm:$0xff]  ;;  %v309_v47 = vld [vmem:[#allocation7 + $0x48] sm:$0xff] }
 0x43b   :  { %v659_v52 = vadd.f32 %v655_v41, %v110_v38  ;;  %2923 = vmatprep.subr.bf16.mxu0 %v2922_v29  ;;  %v308_v41 = vld [vmem:[#allocation7 + $0x40] sm:$0xff]  ;;  %v1152_v32 = vld [vmem:[#allocation7 + $0x128] sm:$0xff] }
 0x43c   :  { %3082 = vpow2.f32 %v660_v48  ;;  %v658_v55 = vadd.f32 %v654_v51, %v109_v46  ;;  %2925 = vmatpush3.bf16.msra.mxu0 %v2922_v29  ;;  %v2926_v38 = vpack.c.bf16 %v522_v31, %v521_v34  ;;  %v2934_v48 = vpack.c.bf16 %v309_v47, %v308_v41  ;;  %v310_v51 = vld [vmem:[#allocation7 + $0x50] sm:$0xff]  ;;  %v1151_v31 = vld [vmem:[#allocation7 + $0x120] sm:$0xff]  ;;  %v80_v41 = vld [vmem:[#allocation5 + $0x18] sm:$0xff] }
 0x43d   :  { %3084 = vpow2.f32 %v662_v40  ;;  %v666_v56 = vmul.f32 1.442695, %v659_v52  ;;  %v307_v40 = vld [vmem:[#allocation7 + $0x38] sm:$0xff]  ;;  %v77_v34 = vld [vmem:[#allocation5] sm:$0xff] }
 0x43e   :  { %v664_v57 = vmul.f32 1.442695, %v658_v55  ;;  %2927 = vmatprep.subr.bf16.mxu0 %v2926_v38  ;;  %v2930_v46 = vpack.c.bf16 %v307_v40, %v306_v39  ;;  %v311_v52 = vld [vmem:[#allocation7 + $0x58] sm:$0xff]  ;;  %v78_v39 = vld [vmem:[#allocation5 + $0x8] sm:$0xff]  ;;  %v79_v40 = vld [vmem:[#allocation5 + $0x10] sm:$0xff] }
 0x43f   :  { %v2938_v55 = vpack.c.bf16 %v311_v52, %v310_v51 }
 0x440   :  { %3086 = vpow2.f32 %v664_v57  ;;  %2929 = vmatpush3.bf16.msra.mxu0 %v2926_v38  ;;  %2931 = vmatprep.subr.bf16.mxu1 %v2930_v46  ;;  %v313_v57 = vld [vmem:[#allocation7 + $0x68] sm:$0xff]  ;;  %v2958_v38 = vpack.c.bf16 %v1152_v32, %v1151_v31 }
 0x441   :  { %3088 = vpow2.f32 %v666_v56  ;;  %v312_v56 = vld [vmem:[#allocation7 + $0x60] sm:$0xff] }
 0x442   :  { %v2942_v6 = vpack.c.bf16 %v313_v57, %v312_v56 }
 0x446   :  { %v3488_v58 = vpop.eup %3082 }
 0x447   :  { %v3490_v59 = vpop.eup %3084  ;;  %2624 = vmatprep.mubr.msk.f32.mxu1 %vm668_vm2, %v3488_v58 }
 0x448   :  { %2625 = vmatmul.mubr.msk.f32.vlgmr.msra.gmra.mrb[20].mxu1 %vm668_vm2, %v3490_v59 }
 0x449   :  { %2933 = vmatpush3.bf16.msra.mxu1 %v2930_v46  ;;  %v874_v46 = vrot.slane %v3404_v10, %v179_v50 }
 0x44a   :  { %v3496_v62 = vpop.eup %3086  ;;  %2935 = vmatprep.subr.bf16.mxu1 %v2934_v48 }
 0x44b   :  { %v3498_v63 = vpop.eup %3088  ;;  %2627 = vmatprep.mubr.msk.f32.mxu1 %vm668_vm2, %v3496_v62 }
 0x44c   :  { %2628 = vmatmul.mubr.msk.f32.gmra.mrb[22].mxu1 %vm668_vm2, %v3498_v63 }
 0x44d   :  { %2937 = vmatpush3.bf16.msra.mxu1 %v2934_v48 }
 0x44e   :  { %2939 = vmatprep.subr.bf16.mxu1 %v2938_v55 }
 0x451   :  { %2941 = vmatpush3.bf16.msra.mxu1 %v2938_v55 }
 0x452   :  { %2943 = vmatprep.subr.bf16.mxu1 %v2942_v6 }
 0x455   :  { %2945 = vmatpush3.bf16.msra.mxu1 %v2942_v6 }
 0x51b   :  { %v2626_v7 = vpop.f32.mrb[20].mxu1 }
 0x51c   :  { %3090 = vrcp.f32 %v2626_v7  ;;  %v747_v8 = vpop.f32.mrb[21].mxu1 }
 0x51d   :  { %3092 = vrcp.f32 %v747_v8 }
 0x51f   :  { %v2629_v9 = vpop.f32.mrb[22].mxu1 }
 0x520   :  { %3094 = vrcp.f32 %v2629_v9  ;;  %v757_v13 = vpop.f32.mrb[23].mxu1 }
 0x521   :  { %3096 = vrcp.f32 %v757_v13 }
 0x526   :  { %v3091_v14 = vpop.eup %3090 }
 0x527   :  { %v3093_v15 = vpop.eup %3092  ;;  %v771_v17 = vmul.f32 %v3091_v14, %v3490_v59 }
 0x528   :  { %v770_v16 = vmul.f32 %v3093_v15, %v3488_v58 }
 0x52a   :  { %v3095_v21 = vpop.eup %3094  ;;  %2646 = vmatprep.mubr.msk.f32.mxu0 %vm668_vm2, %v770_v16 }
 0x52b   :  { %v3097_v22 = vpop.eup %3096  ;;  %2647 = vmatmul.mubr.msk.f32.vlgmr.msra.gmra.mrb[4].mxu0 %vm668_vm2, %v771_v17  ;;  %v773_v25 = vmul.f32 %v3095_v21, %v3498_v63 }
 0x52c   :  { %v772_v23 = vmul.f32 %v3097_v22, %v3496_v62  ;;  %v1150_v62 = vld [vmem:[#allocation7 + $0x118] sm:$0xff] }
 0x52d   :  { %v2954_v63 = vpack.c.bf16 %v1150_v62, %v1149_v30 }
 0x52e   :  { %2649 = vmatprep.mubr.msk.f32.mxu0 %vm668_vm2, %v772_v23 }
 0x52f   :  { %2650 = vmatmul.mubr.msk.f32.gmra.mrb[6].mxu0 %vm668_vm2, %v773_v25  ;;  %2955 = vmatprep.subr.bf16.mxu1 %v2954_v63 }
 0x5fe   :  { %v2648_v26 = vpop.f32.mrb[4].mxu0 }
 0x5ff   :  { %v852_v29 = vpop.f32.mrb[5].mxu0 }
 0x600   :  { %2668 = vmatprep.mubr.msk.f32.mxu1 %vm668_vm2, %v852_v29 }
 0x601   :  { %2669 = vmatmul.mubr.msk.f32.vlgmr.msra.gmra.mrb[24].mxu1 %vm668_vm2, %v2648_v26 }
 0x602   :  { %v2651_v58 = vpop.f32.mrb[6].mxu0  ;;  %2957 = vmatpush3.bf16.msra.mxu1 %v2954_v63 }
 0x603   :  { %v862_v59 = vpop.f32.mrb[7].mxu0  ;;  %2959 = vmatprep.subr.bf16.mxu1 %v2958_v38 }
 0x604   :  { %2671 = vmatprep.mubr.msk.f32.mxu1 %vm668_vm2, %v862_v59 }
 0x605   :  { %2672 = vmatmul.mubr.msk.f32.gmra.mrb[26].mxu1 %vm668_vm2, %v2651_v58 }
 0x606   :  { %2696 = vmatprep.mubr.msk.f32.mxu1 %vm115_vm0, %v77_v34  ;;  %2961 = vmatpush3.bf16.msra.mxu1 %v2958_v38 }
 0x609   :  { %2697 = vmatmul.mubr.msk.f32.vlgmr.msra.gmra.mrb[28].mxu1 %vm115_vm0, %v78_v39  ;;  %v1044_v39 = vld [vmem:[#allocation7 + $0xf0] sm:$0xff] }
 0x60a   :  { %2699 = vmatprep.mubr.msk.f32.mxu1 %vm115_vm0, %v79_v40  ;;  %v1045_v40 = vld [vmem:[#allocation7 + $0xf8] sm:$0xff] }
 0x60d   :  { %2700 = vmatmul.mubr.msk.f32.gmra.mrb[30].mxu1 %vm115_vm0, %v80_v41  ;;  %v2946_v41 = vpack.c.bf16 %v1045_v40, %v1044_v39 }
 0x60f   :  { %2947 = vmatprep.subr.bf16.mxu0 %v2946_v41 }
 0x610   :  { %2949 = vmatpush3.bf16.msra.mxu0 %v2946_v41 }
 0x6d4   :  { %v2670_v47 = vpop.f32.mrb[24].mxu1 }
 0x6d5   :  { %v959_v48 = vadd.f32 %v2670_v47, %v874_v46  ;;  %v953_v51 = vpop.f32.mrb[25].mxu1 }
 0x6d6   :  { %v954_v52 = vadd.f32 %v953_v51, %v874_v46  ;;  %v1047_v51 = vld [vmem:[#allocation7 + $0x108] sm:$0xff] }
 0x6d7   :  { %v3548_v55 = vadd.f32 %v959_v48, %v3369_v2  ;;  %v1046_v48 = vld [vmem:[#allocation7 + $0x100] sm:$0xff] }
 0x6d8   :  { %v3551_v56 = vadd.f32 %v954_v52, %v3365_v0  ;;  %v2673_v57 = vpop.f32.mrb[26].mxu1 }
 0x6d9   :  { %v963_v6 = vpop.f32.mrb[27].mxu1  ;;  %v979_v7 = vsel %vm115_vm0, %v3548_v55, 0.0  ;;  %v969_v8 = vadd.f32 %v2673_v57, %v874_v46  ;;  %v2950_v57 = vpack.c.bf16 %v1047_v51, %v1046_v48 }
 0x6da   :  { %v964_v9 = vadd.f32 %v963_v6, %v874_v46  ;;  %980 = vadd.xlane.f32.xlu1 %v979_v7  ;;  %v976_v50 = vsel %vm115_vm0, %v3551_v56, 0.0  ;;  %v1038_v46 = vsub.s32 3, %v3389_v42 }
 0x6db   :  { %977 = vadd.xlane.f32.xlu0 %v976_v50  ;;  %v3561_v2 = vadd.f32 %v969_v8, %v3375_v5  ;;  %2951 = vmatprep.subr.bf16.mxu0 %v2950_v57 }
 0x6dc   :  { %v3558_v13 = vadd.f32 %v964_v9, %v3367_v1  ;;  %v2698_v47 = vpop.f32.mrb[28].mxu1  ;;  %v1156_v52 = vrot.slane %v3404_v10, %v1038_v46  ;;  %2953 = vmatpush3.bf16.msra.mxu0 %v2950_v57 }
 0x6dd   :  { %v985_v14 = vsel %vm115_vm0, %v3561_v2, 0.0  ;;  %v1235_v6 = vpop.f32.mrb[29].mxu1 }
 0x6de   :  { %v982_v0 = vsel %vm115_vm0, %v3558_v13, 0.0  ;;  %v1241_v7 = vadd.f32 %v2698_v47, %v1156_v52  ;;  %v1236_v8 = vadd.f32 %v1235_v6, %v1156_v52  ;;  %v1039_v47 = vrot.slane %v3392_v49, %v1038_v46  ;;  %v1254_v46 = vld [vmem:[#allocation7 + $0x170] sm:$0xff] }
 0x6df   :  { %983 = vadd.xlane.f32.xlu0 %v982_v0 }
 0x6e0   :  { %v2962_v9 = vpack.c.bf16 %v1241_v7, %v1236_v8  ;;  %v2701_v50 = vpop.f32.mrb[30].mxu1 }
 0x6e1   :  { %v1251_v0 = vadd.f32 %v2701_v50, %v1156_v52 }
 0x6e2   :  { %2963 = vmatprep.subr.bf16.mxu0 %v2962_v9 }
 0x6e3   :  { %986 = vadd.xlane.f32.xlu0 %v985_v14  ;;  %v1245_v14 = vpop.f32.mrb[31].mxu1 }
 0x767   :  { %v981_v15 = vpop.xlane.xlu1 %980 }
 0x768   :  { %v989_v16 = vmul.f32 0.03125, %v981_v15  ;;  %v978_v17 = vpop.xlane.xlu0 %977  ;;  %v1246_v15 = vadd.f32 %v1245_v14, %v1156_v52 }
 0x769   :  { %v988_v21 = vmul.f32 0.03125, %v978_v17 }
 0x76a   :  { %v3568_v22 = vsub.f32 %v3548_v55, %v989_v16  ;;  %v2966_v16 = vpack.c.bf16 %v1251_v0, %v1246_v15  ;;  %v1256_v15 = vld [vmem:[#allocation7 + $0x180] sm:$0xff] }
 0x76b   :  { %v3571_v1 = vsub.f32 %v3551_v56, %v988_v21 }
 0x76c   :  { %v984_v5 = vpop.xlane.xlu0 %983  ;;  %v997_v23 = vmul.f32 %v3568_v22, %v3568_v22 }
 0x76d   :  { %v990_v25 = vmul.f32 0.03125, %v984_v5  ;;  %v996_v26 = vmul.f32 %v3571_v1, %v3571_v1 }
 0x76e   :  { %v1003_v29 = vsel %vm115_vm0, %v997_v23, 0.0 }
 0x76f   :  { %v3579_v58 = vsub.f32 %v3558_v13, %v990_v25  ;;  %1004 = vadd.xlane.f32.xlu1 %v1003_v29  ;;  %v1000_v59 = vsel %vm115_vm0, %v996_v26, 0.0 }
 0x770   :  { %1001 = vadd.xlane.f32.xlu0 %v1000_v59  ;;  %v987_v30 = vpop.xlane.xlu0 %986 }
 0x771   :  { %v991_v62 = vmul.f32 0.03125, %v987_v30  ;;  %v998_v31 = vmul.f32 %v3579_v58, %v3579_v58 }
 0x773   :  { %v3585_v63 = vsub.f32 %v3561_v2, %v991_v62  ;;  %v1006_v32 = vsel %vm115_vm0, %v998_v31, 0.0  ;;  %v1030_v31 = vsub.s32 2, %v3389_v42 }
 0x774   :  { %1007 = vadd.xlane.f32.xlu0 %v1006_v32 }
 0x775   :  { %v999_v34 = vmul.f32 %v3585_v63, %v3585_v63 }
 0x777   :  { %v1009_v38 = vsel %vm115_vm0, %v999_v34, 0.0 }
 0x778   :  { %1010 = vadd.xlane.f32.xlu1 %v1009_v38  ;;  %v1031_v38 = vrot.slane %v3392_v49, %v1030_v31 }
 0x7fc   :  { %v1005_v17 = vpop.xlane.xlu1 %1004 }
 0x7fd   :  { %v1013_v21 = vmul.f32 0.03125, %v1005_v17  ;;  %v1002_v5 = vpop.xlane.xlu0 %1001  ;;  %v1260_v17 = vld [vmem:[#allocation7 + $0x1a0] sm:$0xff] }
 0x7fe   :  { %v1012_v23 = vmul.f32 0.03125, %v1002_v5 }
 0x7ff   :  { %v1017_v25 = vadd.f32 1e-05, %v1013_v21  ;;  %v1261_v21 = vld [vmem:[#allocation7 + $0x1a8] sm:$0xff] }
 0x800   :  { %v1016_v26 = vadd.f32 1e-05, %v1012_v23 }
 0x801   :  { %3098 = vrsqrt.f32 %v1017_v25  ;;  %v1008_v29 = vpop.xlane.xlu0 %1007 }
 0x802   :  { %3100 = vrsqrt.f32 %v1016_v26  ;;  %v1014_v59 = vmul.f32 0.03125, %v1008_v29 }
 0x804   :  { %v1018_v30 = vadd.f32 1e-05, %v1014_v59 }
 0x805   :  { %v1011_v62 = vpop.xlane.xlu1 %1010 }
 0x806   :  { %3102 = vrsqrt.f32 %v1018_v30  ;;  %v1015_v32 = vmul.f32 0.03125, %v1011_v62 }
 0x808   :  { %v1019_v34 = vadd.f32 1e-05, %v1015_v32 }
 0x80a   :  { %3104 = vrsqrt.f32 %v1019_v34 }
 0x80b   :  { %v3099_v39 = vpop.eup %3098 }
 0x80c   :  { %v3101_v40 = vpop.eup %3100  ;;  %v1025_v41 = vmul.f32 %v3099_v39, %v3568_v22 }
 0x80d   :  { %v1024_v48 = vmul.f32 %v3101_v40, %v3571_v1 }
 0x80e   :  { %v1033_v51 = vmul.f32 %v1031_v38, %v1025_v41 }
 0x80f   :  { %v1032_v52 = vmul.f32 %v1031_v38, %v1024_v48  ;;  %v1262_v48 = vld [vmem:[#allocation7 + $0x1b0] sm:$0xff] }
 0x810   :  { %v3103_v57 = vpop.eup %3102  ;;  %v1041_v8 = vadd.f32 %v1039_v47, %v1033_v51  ;;  %v1263_v51 = vld [vmem:[#allocation7 + $0x1b8] sm:$0xff] }
 0x811   :  { %v1040_v6 = vadd.f32 %v1039_v47, %v1032_v52  ;;  %v1026_v7 = vmul.f32 %v3103_v57, %v3579_v58  ;;  %v1255_v58 = vld [vmem:[#allocation7 + $0x178] sm:$0xff]  ;;  %v1264_v52 = vld [vmem:[#allocation7 + $0x1c0] sm:$0xff]  ;;  %v1266_v57 = vld [vmem:[#allocation7 + $0x1d0] sm:$0xff] }
 0x813   :  { %2682 = vmatprep.mubr.msk.f32.mxu0 %vm115_vm0, %v1040_v6  ;;  %v1034_v50 = vmul.f32 %v1031_v38, %v1026_v7  ;;  %v1267_v6 = vld [vmem:[#allocation7 + $0x1d8] sm:$0xff]  ;;  %v1268_v7 = vld [vmem:[#allocation7 + $0x1e0] sm:$0xff] }
 0x814   :  { %v3105_v0 = vpop.eup %3104  ;;  %2683 = vmatmul.mubr.msk.f32.vlgmr.msra.gmra.mrb[8].mxu0 %vm115_vm0, %v1041_v8  ;;  %v1269_v8 = vld [vmem:[#allocation7 + $0x1e8] sm:$0xff] }
 0x815   :  { %2965 = vmatpush3.bf16.msra.mxu0 %v2962_v9  ;;  %v1042_v14 = vadd.f32 %v1039_v47, %v1034_v50  ;;  %v1027_v22 = vmul.f32 %v3105_v0, %v3585_v63  ;;  %v1257_v63 = vld [vmem:[#allocation7 + $0x188] sm:$0xff]  ;;  %v1258_v9 = vld [vmem:[#allocation7 + $0x190] sm:$0xff]  ;;  %v112_v50 = vld [vmem:[#allocation8 + $0x28] sm:$0xff] }
 0x816   :  { %2967 = vmatprep.subr.bf16.mxu0 %v2966_v16 }
 0x817   :  { %2685 = vmatprep.mubr.msk.f32.mxu0 %vm115_vm0, %v1042_v14  ;;  %v1035_v49 = vmul.f32 %v1031_v38, %v1027_v22  ;;  %v111_v22 = vld [vmem:[#allocation8 + $0x20] sm:$0xff] }
 0x819   :  { %2969 = vmatpush3.bf16.msra.mxu0 %v2966_v16  ;;  %v1043_v1 = vadd.f32 %v1039_v47, %v1035_v49  ;;  %v1259_v16 = vld [vmem:[#allocation7 + $0x198] sm:$0xff] }
 0x81a   :  { %2995 = vmatprep.subr.bf16.mxu0 %v3415_v33 }
 0x81b   :  { %2686 = vmatmul.mubr.msk.f32.gmra.mrb[10].mxu0 %vm115_vm0, %v1043_v1 }
 0x81c   :  { %2710 = vmatprep.mubr.msk.f32.mxu0 %vm115_vm0, %v1254_v46 }
 0x81f   :  { %2711 = vmatmul.mubr.msk.f32.vlgmr.msra.gmra.mrb[12].mxu0 %vm115_vm0, %v1255_v58 }
 0x820   :  { %2713 = vmatprep.mubr.msk.f32.mxu0 %vm115_vm0, %v1256_v15  ;;  %2997 = vmatpush3.bf16.msra.mxu0 %v3415_v33  ;;  %v1051_v33 = vrot.slane %v3404_v10, %v1030_v31  ;;  %v114_v15 = vld [vmem:[#allocation8 + $0x38] sm:$0xff] }
 0x821   :  { %2999 = vmatprep.subr.bf16.mxu0 %v3417_v35 }
 0x823   :  { %2714 = vmatmul.mubr.msk.f32.gmra.mrb[14].mxu0 %vm115_vm0, %v1257_v63 }
 0x824   :  { %2716 = vmatprep.mubr.msk.f32.mxu0 %vm115_vm0, %v1258_v9  ;;  %3001 = vmatpush3.bf16.msra.mxu0 %v3417_v35 }
 0x825   :  { %3003 = vmatprep.subr.bf16.mxu0 %v3477_v20 }
 0x827   :  { %2717 = vmatmul.mubr.msk.f32.gmra.mrb[16].mxu0 %vm115_vm0, %v1259_v16 }
 0x828   :  { %2719 = vmatprep.mubr.msk.f32.mxu0 %vm115_vm0, %v1260_v17  ;;  %3005 = vmatpush3.bf16.msra.mxu0 %v3477_v20  ;;  %v113_v17 = vld [vmem:[#allocation8 + $0x30] sm:$0xff] }
 0x829   :  { %3007 = vmatprep.subr.bf16.mxu0 %v3481_v24 }
 0x82b   :  { %2720 = vmatmul.mubr.msk.f32.gmra.mrb[18].mxu0 %vm115_vm0, %v1261_v21 }
 0x82c   :  { %3009 = vmatpush3.bf16.msra.mxu0 %v3481_v24  ;;  %2722 = vmatprep.mubr.msk.f32.mxu0 %vm115_vm0, %v1262_v48  ;;  %v1273_v48 = vld [vmem:[#allocation7 + $0x148] sm:$0xff] }
 0x82f   :  { %2723 = vmatmul.mubr.msk.f32.gmra.mrb[20].mxu0 %vm115_vm0, %v1263_v51  ;;  %v1274_v51 = vld [vmem:[#allocation7 + $0x150] sm:$0xff] }
 0x830   :  { %2725 = vmatprep.mubr.msk.f32.mxu0 %vm115_vm0, %v1264_v52  ;;  %v1275_v52 = vld [vmem:[#allocation7 + $0x158] sm:$0xff] }
 0x833   :  { %2726 = vmatmul.mubr.msk.f32.gmra.mrb[22].mxu0 %vm115_vm0, %v1265_v44  ;;  %v1276_v44 = vld [vmem:[#allocation7 + $0x160] sm:$0xff] }
 0x834   :  { %2728 = vmatprep.mubr.msk.f32.mxu0 %vm115_vm0, %v1266_v57  ;;  %v1277_v57 = vld [vmem:[#allocation7 + $0x168] sm:$0xff] }
 0x837   :  { %2729 = vmatmul.mubr.msk.f32.gmra.mrb[24].mxu0 %vm115_vm0, %v1267_v6 }
 0x838   :  { %2731 = vmatprep.mubr.msk.f32.mxu0 %vm115_vm0, %v1268_v7 }
 0x83b   :  { %2732 = vmatmul.mubr.msk.f32.gmra.mrb[26].mxu0 %vm115_vm0, %v1269_v8 }
 0x8e7   :  { %v2684_v5 = vpop.f32.mrb[8].mxu0 }
 0x8e8   :  { %v1130_v35 = vpop.f32.mrb[9].mxu0 }
 0x8e9   :  { %v1131_v23 = vadd.f32 %v1130_v35, %v1051_v33 }
 0x8eb   :  { %2750 = vmatprep.mubr.msk.f32.mxu1 %vm115_vm0, %v1131_v23 }
 0x8ee   :  { %v2687_v25 = vpop.f32.mrb[10].mxu0 }
 0x8ef   :  { %v1140_v26 = vpop.f32.mrb[11].mxu0 }
 0x8f2   :  { %v2712_v29 = vpop.f32.mrb[12].mxu0 }
 0x8f3   :  { %v1472_v59 = vmul.f32 %v2712_v29, %v3423_v36  ;;  %v1392_v30 = vpop.f32.mrb[13].mxu0 }
 0x8f4   :  { %v1471_v20 = vmul.f32 %v1392_v30, %v3425_v37 }
 0x8f6   :  { %v2970_v62 = vpack.c.bf16 %v1472_v59, %v1471_v20  ;;  %v2715_v32 = vpop.f32.mrb[14].mxu0 }
 0x8f7   :  { %v1474_v34 = vmul.f32 %v2715_v32, %v3429_v43  ;;  %v1402_v24 = vpop.f32.mrb[15].mxu0 }
 0x8f8   :  { %2972 = vmatprep.subr.msk.bf16.mxu1 %vm3433_vm1, %v2970_v62  ;;  %v1473_v10 = vmul.f32 %v1402_v24, %v3437_v45 }
 0x8f9   :  { %2975 = vmatpush3.bf16.xpose.msk.msra.mxu1 %vm3433_vm1, %v2970_v62 }
 0x8fa   :  { %v2976_v31 = vpack.c.bf16 %v1474_v34, %v1473_v10  ;;  %v2718_v38 = vpop.f32.mrb[16].mxu0 }
 0x8fb   :  { %v1476_v36 = vmul.f32 %v2718_v38, %v3443_v53  ;;  %v1412_v39 = vpop.f32.mrb[17].mxu0 }
 0x8fc   :  { %2978 = vmatprep.subr.msk.bf16.mxu1 %vm3433_vm1, %v2976_v31  ;;  %v1475_v37 = vmul.f32 %v1412_v39, %v3447_v54  ;;  %v1136_v54 = vadd.f32 %v2684_v5, %v1051_v33 }
 0x8fe   :  { %v2982_v43 = vpack.c.bf16 %v1476_v36, %v1475_v37  ;;  %v2721_v40 = vpop.f32.mrb[18].mxu0 }
 0x8ff   :  { %v1478_v41 = vmul.f32 %v2721_v40, %v3453_v60  ;;  %v1422_v47 = vpop.f32.mrb[19].mxu0  ;;  %v1141_v60 = vadd.f32 %v1140_v26, %v1051_v33 }
 0x900   :  { %v1477_v45 = vmul.f32 %v1422_v47, %v3455_v61  ;;  %v1146_v61 = vadd.f32 %v2687_v25, %v1051_v33 }
 0x901   :  { %2981 = vmatpush3.bf16.xpose.msk.msra.mxu1 %vm3433_vm1, %v2976_v31 }
 0x902   :  { %2984 = vmatprep.subr.msk.bf16.mxu1 %vm3433_vm1, %v2982_v43  ;;  %v2988_v53 = vpack.c.bf16 %v1478_v41, %v1477_v45  ;;  %v2724_v62 = vpop.f32.mrb[20].mxu0 }
 0x903   :  { %v1480_v32 = vmul.f32 %v2724_v62, %v3504_v3  ;;  %v1432_v34 = vpop.f32.mrb[21].mxu0 }
 0x904   :  { %v1479_v24 = vmul.f32 %v1432_v34, %v3506_v4 }
 0x906   :  { %v3010_v10 = vpack.c.bf16 %v1480_v32, %v1479_v24  ;;  %v2727_v31 = vpop.f32.mrb[22].mxu0 }
 0x907   :  { %v1482_v38 = vmul.f32 %v2727_v31, %v3510_v11  ;;  %v1442_v36 = vpop.f32.mrb[23].mxu0 }
 0x908   :  { %v1481_v39 = vmul.f32 %v1442_v36, %v3512_v12 }
 0x909   :  { %2987 = vmatpush3.bf16.xpose.msk.msra.mxu1 %vm3433_vm1, %v2982_v43 }
 0x90a   :  { %2990 = vmatprep.subr.msk.bf16.mxu1 %vm3433_vm1, %v2988_v53  ;;  %v3014_v37 = vpack.c.bf16 %v1482_v38, %v1481_v39  ;;  %v2730_v43 = vpop.f32.mrb[24].mxu0 }
 0x90b   :  { %v1484_v40 = vmul.f32 %v2730_v43, %v3516_v18  ;;  %v1452_v41 = vpop.f32.mrb[25].mxu0  ;;  %v1272_v18 = vld [vmem:[#allocation7 + $0x140] sm:$0xff] }
 0x90c   :  { %v1483_v47 = vmul.f32 %v1452_v41, %v3518_v19  ;;  %v3030_v19 = vpack.c.bf16 %v1273_v48, %v1272_v18 }
 0x90e   :  { %v3018_v3 = vpack.c.bf16 %v1484_v40, %v1483_v47  ;;  %v2733_v4 = vpop.f32.mrb[26].mxu0 }
 0x90f   :  { %v1486_v45 = vmul.f32 %v2733_v4, %v3522_v27  ;;  %v3034_v27 = vpack.c.bf16 %v1275_v52, %v1274_v51 }
 0x911   :  { %2993 = vmatpush3.bf16.xpose.msk.msra.mxu1 %vm3433_vm1, %v2988_v53  ;;  %v1462_v53 = vpop.f32.mrb[27].mxu0 }
 0x912   :  { %3011 = vmatprep.subr.bf16.mxu1 %v3010_v10  ;;  %v1485_v11 = vmul.f32 %v1462_v53, %v3524_v28  ;;  %v3038_v28 = vpack.c.bf16 %v1277_v57, %v1276_v44  ;;  %v2000_v44 = vld [vmem:[#allocation7 + $0x1f8] sm:$0xff] }
 0x914   :  { %v3022_v12 = vpack.c.bf16 %v1486_v45, %v1485_v11 }
 0x918   :  { %2751 = vmatmul.mubr.msk.f32.vlgmr.msra.gmra.mrb[32].mxu1 %vm115_vm0, %v1136_v54  ;;  %v1270_v54 = vld [vmem:[#allocation7 + $0x130] sm:$0xff] }
 0x919   :  { %2753 = vmatprep.mubr.msk.f32.mxu1 %vm115_vm0, %v1141_v60  ;;  %3013 = vmatpush3.bf16.msra.mxu1 %v3010_v10  ;;  %v1271_v60 = vld [vmem:[#allocation7 + $0x138] sm:$0xff] }
 0x91a   :  { %3015 = vmatprep.subr.bf16.mxu1 %v3014_v37 }
 0x91c   :  { %2754 = vmatmul.mubr.msk.f32.gmra.mrb[34].mxu1 %vm115_vm0, %v1146_v61  ;;  %v3026_v61 = vpack.c.bf16 %v1271_v60, %v1270_v54 }
 0x91d   :  { %3017 = vmatpush3.bf16.msra.mxu1 %v3014_v37 }
 0x91e   :  { %3019 = vmatprep.subr.bf16.mxu1 %v3018_v3  ;;  %3027 = vmatprep.subr.bf16.mxu0 %v3026_v61 }
 0x921   :  { %3021 = vmatpush3.bf16.msra.mxu1 %v3018_v3 }
 0x922   :  { %3023 = vmatprep.subr.bf16.mxu1 %v3022_v12 }
 0x925   :  { %3025 = vmatpush3.bf16.msra.mxu1 %v3022_v12 }
 0x9eb   :  { %v2752_v0 = vpop.f32.mrb[32].mxu1 }
 0x9ec   :  { %v1609_v14 = vmul.f32 0.35355338, %v2752_v0  ;;  %v1589_v49 = vpop.f32.mrb[33].mxu1 }
 0x9ed   :  { %v1608_v1 = vmul.f32 0.35355338, %v1589_v49 }
 0x9ee   :  { %v1613_v46 = vadd.f32 %v1609_v14, %v112_v50 }
 0x9ef   :  { %v1612_v58 = vadd.f32 %v1608_v1, %v111_v22  ;;  %v2755_v63 = vpop.f32.mrb[34].mxu1 }
 0x9f0   :  { %v1618_v9 = vmul.f32 1.442695, %v1613_v46  ;;  %v1611_v16 = vmul.f32 0.35355338, %v2755_v63  ;;  %v1599_v21 = vpop.f32.mrb[35].mxu1 }
 0x9f1   :  { %v1616_v33 = vmul.f32 1.442695, %v1612_v58  ;;  %v1610_v5 = vmul.f32 0.35355338, %v1599_v21  ;;  %v1828_v21 = vsub.s32 4, %v3389_v42 }
 0x9f2   :  { %v1615_v35 = vadd.f32 %v1611_v16, %v114_v15 }
 0x9f3   :  { %3106 = vpow2.f32 %v1616_v33  ;;  %v1614_v23 = vadd.f32 %v1610_v5, %v113_v17  ;;  %v3694_v33 = vld [vmem:[#allocation7 + $0x8] sm:$0xff] }
 0x9f4   :  { %3108 = vpow2.f32 %v1618_v9  ;;  %v1622_v25 = vmul.f32 1.442695, %v1615_v35  ;;  %v1829_v5 = vrot.slane %v3694_v33, %v1828_v21 }
 0x9f5   :  { %v1620_v26 = vmul.f32 1.442695, %v1614_v23 }
 0x9f7   :  { %3110 = vpow2.f32 %v1620_v26 }
 0x9f8   :  { %3112 = vpow2.f32 %v1622_v25 }
 0x9fd   :  { %v3657_v29 = vpop.eup %3106 }
 0x9fe   :  { %v3659_v59 = vpop.eup %3108  ;;  %2772 = vmatprep.mubr.msk.f32.mxu0 %vm668_vm2, %v3657_v29 }
 0x9ff   :  { %2773 = vmatmul.mubr.msk.f32.vlgmr.msra.gmra.mrb[28].mxu0 %vm668_vm2, %v3659_v59 }
 0xa00   :  { %3029 = vmatpush3.bf16.msra.mxu0 %v3026_v61 }
 0xa01   :  { %v3665_v30 = vpop.eup %3110  ;;  %3031 = vmatprep.subr.bf16.mxu0 %v3030_v19 }
 0xa02   :  { %v3667_v20 = vpop.eup %3112  ;;  %2775 = vmatprep.mubr.msk.f32.mxu0 %vm668_vm2, %v3665_v30 }
 0xa03   :  { %2776 = vmatmul.mubr.msk.f32.gmra.mrb[30].mxu0 %vm668_vm2, %v3667_v20 }
 0xa04   :  { %3033 = vmatpush3.bf16.msra.mxu0 %v3030_v19 }
 0xa05   :  { %3035 = vmatprep.subr.bf16.mxu0 %v3034_v27 }
 0xa08   :  { %3037 = vmatpush3.bf16.msra.mxu0 %v3034_v27  ;;  %v1999_v27 = vld [vmem:[#allocation7 + $0x1f0] sm:$0xff] }
 0xa09   :  { %3039 = vmatprep.subr.bf16.mxu0 %v3038_v28  ;;  %v3042_v57 = vpack.c.bf16 %v2000_v44, %v1999_v27 }
 0xa0b   :  { %3043 = vmatprep.subr.bf16.mxu1 %v3042_v57 }
 0xa0c   :  { %3041 = vmatpush3.bf16.msra.mxu0 %v3038_v28  ;;  %v2001_v28 = vld [vmem:[#allocation7 + $0x200] sm:$0xff] }
 0xad2   :  { %v2774_v6 = vpop.f32.mrb[28].mxu0 }
 0xad3   :  { %3114 = vrcp.f32 %v2774_v6  ;;  %v1702_v7 = vpop.f32.mrb[29].mxu0  ;;  %v2002_v6 = vld [vmem:[#allocation7 + $0x208] sm:$0xff] }
 0xad4   :  { %3116 = vrcp.f32 %v1702_v7  ;;  %v3046_v7 = vpack.c.bf16 %v2002_v6, %v2001_v28 }
 0xad6   :  { %v2777_v8 = vpop.f32.mrb[30].mxu0 }
 0xad7   :  { %3118 = vrcp.f32 %v2777_v8  ;;  %v1712_v50 = vpop.f32.mrb[31].mxu0 }
 0xad8   :  { %3120 = vrcp.f32 %v1712_v50 }
 0xadd   :  { %v3115_v0 = vpop.eup %3114 }
 0xade   :  { %v3117_v14 = vpop.eup %3116  ;;  %v1726_v49 = vmul.f32 %v3115_v0, %v3659_v59 }
 0xadf   :  { %v1725_v22 = vmul.f32 %v3117_v14, %v3657_v29 }
 0xae1   :  { %v3119_v1 = vpop.eup %3118  ;;  %2794 = vmatprep.mubr.msk.f32.mxu1 %vm668_vm2, %v1725_v22 }
 0xae2   :  { %v3121_v46 = vpop.eup %3120  ;;  %2795 = vmatmul.mubr.msk.f32.vlgmr.msra.gmra.mrb[36].mxu1 %vm668_vm2, %v1726_v49  ;;  %v1728_v15 = vmul.f32 %v3119_v1, %v3667_v20 }
 0xae3   :  { %v1727_v58 = vmul.f32 %v3121_v46, %v3665_v30  ;;  %3045 = vmatpush3.bf16.msra.mxu1 %v3042_v57 }
 0xae4   :  { %3047 = vmatprep.subr.bf16.mxu1 %v3046_v7 }
 0xae5   :  { %2797 = vmatprep.mubr.msk.f32.mxu1 %vm668_vm2, %v1727_v58 }
 0xae6   :  { %2798 = vmatmul.mubr.msk.f32.gmra.mrb[38].mxu1 %vm668_vm2, %v1728_v15 }
 0xae7   :  { %3049 = vmatpush3.bf16.msra.mxu1 %v3046_v7 }
 0xbb5   :  { %v2796_v63 = vpop.f32.mrb[36].mxu1 }
 0xbb6   :  { %v1807_v9 = vpop.f32.mrb[37].mxu1 }
 0xbb7   :  { %2816 = vmatprep.mubr.msk.f32.mxu0 %vm668_vm2, %v1807_v9 }
 0xbb8   :  { %2817 = vmatmul.mubr.msk.f32.vlgmr.msra.gmra.mrb[32].mxu0 %vm668_vm2, %v2796_v63 }
 0xbb9   :  { %v2799_v16 = vpop.f32.mrb[38].mxu1 }
 0xbba   :  { %v1817_v17 = vpop.f32.mrb[39].mxu1 }
 0xbbb   :  { %2819 = vmatprep.mubr.msk.f32.mxu0 %vm668_vm2, %v1817_v17  ;;  %v3139_v17 = vld [vmem:[#allocation7] sm:$0x3f] }
 0xbbc   :  { %2820 = vmatmul.mubr.msk.f32.gmra.mrb[34].mxu0 %vm668_vm2, %v2799_v16  ;;  %v1993_v16 = vsub.s32 5, %v3389_v42 }
 0xc8b   :  { %v2818_v35 = vpop.f32.mrb[32].mxu0 }
 0xc8c   :  { %v1914_v23 = vadd.f32 %v2818_v35, %v1829_v5  ;;  %v1908_v25 = vpop.f32.mrb[33].mxu0 }
 0xc8d   :  { %v1909_v26 = vadd.f32 %v1908_v25, %v1829_v5 }
 0xc8e   :  { %v1928_v29 = vadd.f32 %v1914_v23, %v3548_v55 }
 0xc8f   :  { %v2821_v59 = vpop.f32.mrb[34].mxu0  ;;  %v1927_v30 = vadd.f32 %v1909_v26, %v3551_v56 }
 0xc90   :  { %v1924_v20 = vadd.f32 %v2821_v59, %v1829_v5  ;;  %v1918_v62 = vpop.f32.mrb[35].mxu0  ;;  %v1934_v32 = vsel %vm115_vm0, %v1928_v29, 0.0 }
 0xc91   :  { %v1919_v34 = vadd.f32 %v1918_v62, %v1829_v5  ;;  %1935 = vadd.xlane.f32.xlu1 %v1934_v32  ;;  %v1931_v24 = vsel %vm115_vm0, %v1927_v30, 0.0  ;;  %v1986_v5 = vrot.slane %v3139_v17, %v1828_v21 }
 0xc92   :  { %1932 = vadd.xlane.f32.xlu0 %v1931_v24  ;;  %v1930_v10 = vadd.f32 %v1924_v20, %v3561_v2 }
 0xc93   :  { %v1929_v31 = vadd.f32 %v1919_v34, %v3558_v13 }
 0xc94   :  { %v1940_v38 = vsel %vm115_vm0, %v1930_v10, 0.0 }
 0xc95   :  { %1941 = vadd.xlane.f32.xlu1 %v1940_v38  ;;  %v1937_v36 = vsel %vm115_vm0, %v1929_v31, 0.0 }
 0xc96   :  { %1938 = vadd.xlane.f32.xlu0 %v1937_v36 }
 0xd1e   :  { %v1936_v39 = vpop.xlane.xlu1 %1935 }
 0xd1f   :  { %v1944_v37 = vmul.f32 0.03125, %v1936_v39  ;;  %v1933_v43 = vpop.xlane.xlu0 %1932  ;;  %v2124_v39 = vld [vmem:[#allocation7 + $0x210] sm:$0xff] }
 0xd20   :  { %v1943_v40 = vmul.f32 0.03125, %v1933_v43 }
 0xd21   :  { %v1948_v41 = vsub.f32 %v1928_v29, %v1944_v37  ;;  %v1994_v29 = vrot.slane %v3139_v17, %v1993_v16  ;;  %v2125_v37 = vld [vmem:[#allocation7 + $0x218] sm:$0xff] }
 0xd22   :  { %v1947_v47 = vsub.f32 %v1927_v30, %v1943_v40  ;;  %v1942_v3 = vpop.xlane.xlu1 %1941  ;;  %v3050_v43 = vpack.c.bf16 %v2125_v37, %v2124_v39  ;;  %v2126_v40 = vld [vmem:[#allocation7 + $0x220] sm:$0xff] }
 0xd23   :  { %v1946_v4 = vmul.f32 0.03125, %v1942_v3  ;;  %v1939_v45 = vpop.xlane.xlu0 %1938  ;;  %v1952_v53 = vmul.f32 %v1948_v41, %v1948_v41  ;;  %v2128_v3 = vld [vmem:[#allocation7 + $0x230] sm:$0xff] }
 0xd24   :  { %v1945_v11 = vmul.f32 0.03125, %v1939_v45  ;;  %v1951_v12 = vmul.f32 %v1947_v47, %v1947_v47  ;;  %3051 = vmatprep.subr.bf16.mxu0 %v3050_v43 }
 0xd25   :  { %v1950_v54 = vsub.f32 %v1930_v10, %v1946_v4  ;;  %v1958_v60 = vsel %vm115_vm0, %v1952_v53, 0.0  ;;  %3053 = vmatpush3.bf16.msra.mxu0 %v3050_v43  ;;  %v2129_v4 = vld [vmem:[#allocation7 + $0x238] sm:$0xff]  ;;  %v2130_v53 = vld [vmem:[#allocation7 + $0x240] sm:$0xff] }
 0xd26   :  { %v1949_v18 = vsub.f32 %v1929_v31, %v1945_v11  ;;  %1959 = vadd.xlane.f32.xlu1 %v1958_v60  ;;  %v1955_v61 = vsel %vm115_vm0, %v1951_v12, 0.0  ;;  %v3058_v45 = vpack.c.bf16 %v2129_v4, %v2128_v3  ;;  %v2131_v11 = vld [vmem:[#allocation7 + $0x248] sm:$0xff] }
 0xd27   :  { %1956 = vadd.xlane.f32.xlu0 %v1955_v61  ;;  %v1954_v48 = vmul.f32 %v1950_v54, %v1950_v54  ;;  %v3062_v12 = vpack.c.bf16 %v2131_v11, %v2130_v53 }
 0xd28   :  { %v1953_v19 = vmul.f32 %v1949_v18, %v1949_v18 }
 0xd29   :  { %v1964_v51 = vsel %vm115_vm0, %v1954_v48, 0.0 }
 0xd2a   :  { %1965 = vadd.xlane.f32.xlu1 %v1964_v51  ;;  %v1961_v52 = vsel %vm115_vm0, %v1953_v19, 0.0 }
 0xd2b   :  { %1962 = vadd.xlane.f32.xlu0 %v1961_v52 }
 0xdb3   :  { %v1960_v8 = vpop.xlane.xlu1 %1959 }
 0xdb4   :  { %v1968_v50 = vmul.f32 0.03125, %v1960_v8  ;;  %v1957_v0 = vpop.xlane.xlu0 %1956 }
 0xdb5   :  { %v1967_v14 = vmul.f32 0.03125, %v1957_v0 }
 0xdb6   :  { %v1972_v22 = vadd.f32 1e-05, %v1968_v50 }
 0xdb7   :  { %v1971_v49 = vadd.f32 1e-05, %v1967_v14  ;;  %v1966_v1 = vpop.xlane.xlu1 %1965 }
 0xdb8   :  { %3122 = vrsqrt.f32 %v1972_v22  ;;  %v1970_v46 = vmul.f32 0.03125, %v1966_v1  ;;  %v1963_v58 = vpop.xlane.xlu0 %1962 }
 0xdb9   :  { %3124 = vrsqrt.f32 %v1971_v49  ;;  %v1969_v15 = vmul.f32 0.03125, %v1963_v58 }
 0xdba   :  { %v1974_v63 = vadd.f32 1e-05, %v1970_v46 }
 0xdbb   :  { %v1973_v9 = vadd.f32 1e-05, %v1969_v15 }
 0xdbc   :  { %3126 = vrsqrt.f32 %v1974_v63 }
 0xdbd   :  { %3128 = vrsqrt.f32 %v1973_v9 }
 0xdc2   :  { %v3123_v35 = vpop.eup %3122 }
 0xdc3   :  { %v3125_v23 = vpop.eup %3124  ;;  %v1980_v25 = vmul.f32 %v3123_v35, %v1948_v41  ;;  %v2127_v41 = vld [vmem:[#allocation7 + $0x228] sm:$0xff]  ;;  %v2134_v35 = vsub.s32 6, %v3389_v42 }
 0xdc4   :  { %v1979_v26 = vmul.f32 %v3125_v23, %v1947_v47  ;;  %v3054_v47 = vpack.c.bf16 %v2127_v41, %v2126_v40 }
 0xdc5   :  { %v1988_v59 = vmul.f32 %v1986_v5, %v1980_v25  ;;  %v2135_v23 = vrot.slane %v3694_v33, %v2134_v35 }
 0xdc6   :  { %v3127_v30 = vpop.eup %3126  ;;  %v1987_v20 = vmul.f32 %v1986_v5, %v1979_v26  ;;  %3055 = vmatprep.subr.bf16.mxu0 %v3054_v47 }
 0xdc7   :  { %v3129_v62 = vpop.eup %3128  ;;  %v1982_v32 = vmul.f32 %v3127_v30, %v1950_v54  ;;  %v1996_v10 = vadd.f32 %v1994_v29, %v1988_v59  ;;  %3057 = vmatpush3.bf16.msra.mxu0 %v3054_v47  ;;  %v2006_v54 = vrot.slane %v3694_v33, %v1993_v16 }
 0xdc8   :  { %v1995_v34 = vadd.f32 %v1994_v29, %v1987_v20  ;;  %v1981_v24 = vmul.f32 %v3129_v62, %v1949_v18  ;;  %3059 = vmatprep.subr.bf16.mxu0 %v3058_v45 }
 0xdc9   :  { %v1990_v31 = vmul.f32 %v1986_v5, %v1982_v32 }
 0xdca   :  { %2830 = vmatprep.mubr.msk.f32.mxu1 %vm115_vm0, %v1995_v34  ;;  %v1989_v38 = vmul.f32 %v1986_v5, %v1981_v24 }
 0xdcb   :  { %2831 = vmatmul.mubr.msk.f32.vlgmr.msra.gmra.mrb[40].mxu1 %vm115_vm0, %v1996_v10  ;;  %v1998_v36 = vadd.f32 %v1994_v29, %v1990_v31  ;;  %3061 = vmatpush3.bf16.msra.mxu0 %v3058_v45 }
 0xdcc   :  { %v1997_v21 = vadd.f32 %v1994_v29, %v1989_v38  ;;  %3063 = vmatprep.subr.bf16.mxu0 %v3062_v12 }
 0xdce   :  { %2833 = vmatprep.mubr.msk.f32.mxu1 %vm115_vm0, %v1997_v21 }
 0xdcf   :  { %2834 = vmatmul.mubr.msk.f32.gmra.mrb[42].mxu1 %vm115_vm0, %v1998_v36  ;;  %3065 = vmatpush3.bf16.msra.mxu0 %v3062_v12 }
 0xe9e   :  { %v2832_v60 = vpop.f32.mrb[40].mxu1 }
 0xe9f   :  { %v2091_v18 = vadd.f32 %v2832_v60, %v2006_v54  ;;  %v2085_v61 = vpop.f32.mrb[41].mxu1 }
 0xea0   :  { %v2086_v48 = vadd.f32 %v2085_v61, %v2006_v54 }
 0xea1   :  { %v2109_v19 = vmul.f32 0.70710677, %v2091_v18  ;;  %v2105_v22 = vmul.f32 0.5, %v2091_v18 }
 0xea2   :  { %v2108_v51 = vmul.f32 0.70710677, %v2086_v48  ;;  %v2835_v52 = vpop.f32.mrb[42].mxu1  ;;  %v2104_v0 = vmul.f32 0.5, %v2086_v48 }
 0xea3   :  { %3130 = verf.f32 %v2109_v19  ;;  %v2101_v27 = vadd.f32 %v2835_v52, %v2006_v54  ;;  %v2095_v44 = vpop.f32.mrb[43].mxu1 }
 0xea4   :  { %3132 = verf.f32 %v2108_v51  ;;  %v2096_v57 = vadd.f32 %v2095_v44, %v2006_v54 }
 0xea5   :  { %v2111_v28 = vmul.f32 0.70710677, %v2101_v27  ;;  %v2107_v16 = vmul.f32 0.5, %v2101_v27 }
 0xea6   :  { %v2110_v6 = vmul.f32 0.70710677, %v2096_v57  ;;  %v2106_v63 = vmul.f32 0.5, %v2096_v57 }
 0xea7   :  { %3134 = verf.f32 %v2111_v28 }
 0xea8   :  { %3136 = verf.f32 %v2110_v6 }
 0xead   :  { %v3131_v7 = vpop.eup %3130 }
 0xeae   :  { %v3133_v8 = vpop.eup %3132  ;;  %v2117_v50 = vadd.f32 1.0, %v3131_v7 }
 0xeaf   :  { %v2116_v14 = vadd.f32 1.0, %v3133_v8 }
 0xeb0   :  { %v2121_v58 = vmul.f32 %v2117_v50, %v2105_v22 }
 0xeb1   :  { %v3135_v49 = vpop.eup %3134  ;;  %v2120_v1 = vmul.f32 %v2116_v14, %v2104_v0 }
 0xeb2   :  { %v3137_v46 = vpop.eup %3136  ;;  %v2119_v15 = vadd.f32 1.0, %v3135_v49 }
 0xeb3   :  { %v2118_v9 = vadd.f32 1.0, %v3137_v46  ;;  %2852 = vmatprep.mubr.msk.f32.mxu0 %vm668_vm2, %v2120_v1 }
 0xeb4   :  { %2853 = vmatmul.mubr.msk.f32.vlgmr.msra.gmra.mrb[36].mxu0 %vm668_vm2, %v2121_v58  ;;  %v2123_v5 = vmul.f32 %v2119_v15, %v2107_v16 }
 0xeb5   :  { %v2122_v17 = vmul.f32 %v2118_v9, %v2106_v63 }
 0xeb7   :  { %2855 = vmatprep.mubr.msk.f32.mxu0 %vm668_vm2, %v2122_v17 }
 0xeb8   :  { %2856 = vmatmul.mubr.msk.f32.gmra.mrb[38].mxu0 %vm668_vm2, %v2123_v5 }
 0xf87   :  { %v2854_v25 = vpop.f32.mrb[36].mxu0 }
 0xf88   :  { %v2220_v26 = vadd.f32 %v2854_v25, %v2135_v23  ;;  %v2214_v29 = vpop.f32.mrb[37].mxu0 }
 0xf89   :  { %v2215_v59 = vadd.f32 %v2214_v29, %v2135_v23 }
 0xf8a   :  { %v2234_v30 = vadd.f32 %v2220_v26, %v3548_v55 }
 0xf8b   :  { %v2233_v20 = vadd.f32 %v2215_v59, %v3551_v56  ;;  %v2857_v62 = vpop.f32.mrb[38].mxu0 }
 0xf8c   :  { %2238 = vst.msk [vmem:[#allocation10 + $0x8] sm:$0xff] %vm115_vm0, %v2234_v30  ;;  %v2230_v32 = vadd.f32 %v2857_v62, %v2135_v23  ;;  %v2224_v34 = vpop.f32.mrb[39].mxu0 }
 0xf8d   :  { %2237 = vst.msk [vmem:[#allocation10] sm:$0xff] %vm115_vm0, %v2233_v20  ;;  %v2225_v42 = vadd.f32 %v2224_v34, %v2135_v23 }
 0xf8e   :  { %v2236_v33 = vadd.f32 %v2230_v32, %v3561_v2 }
 0xf8f   :  { %v2235_v24 = vadd.f32 %v2225_v42, %v3558_v13 }
 0xf90   :  { %2240 = vst.msk [vmem:[#allocation10 + $0x18] sm:$0xff] %vm115_vm0, %v2236_v33 }
 0xf91   :  { %2239 = vst.msk [vmem:[#allocation10 + $0x10] sm:$0xff] %vm115_vm0, %v2235_v24 }
 0xf92   :  { %3239 = shalt.err (!%p3236_p8)
}
 0xf93   :  { %s3240_s16 = scalar_lea.hbm %s3752_s4, 512 }
 0xf94   :  { %p3241_p9 = scmp.ne.s32.totalorder %s3752_s4, %s3240_s16  ;;  %p3244_p10 = scmp.lt.u32.totalorder %s3240_s16, %s3752_s4 }
 0xf96   :  { %p3246_p11 = pnand %p3244_p10, %p3241_p9 }
 0xf98   :  { %3249 = shalt.err (!%p3246_p11)
}
 0xf99   :  { %2252 = dma.vmem_to_hbm [thread:$0]  %s2247_s1, 512, %s3752_s4, [#allocation4], %s3260_s27, %s3260_s27, %s3261_s28  }
 0xf9a   :  { %3256 = dma.done.wait [#allocation4], 512  }
 0xf9b   :  { %3257 = vsyncadd [#allocation4], 4294966784 }
 0xf9c   :  { %2256 = vsyncpa [#allocation3], 1 }
 0xf9d   :  { %2257 = vsyncpa [#allocation6], 1 }
 0xf9e   :  { %2258 = vsyncpa [#allocation9], 1 }
 0xf9f   :  { %2259 = vsyncpa [#allocation4], 1 }

</bundles_post_ra>
